<compile_context>
chip_gen: v5e
topology: v5e:2x2
jax: 0.10.0
libtpu: 0.0.40
codegen_flags: <defaults>
</compile_context>

<pallas_src>
import jax
import jax.numpy as jnp
from jax.experimental import pallas as pl
from jax.experimental.pallas import tpu as pltpu

P1, P2 = 14, 14
IN_FEATURES = 588      # c * 14 * 14  (c == 3)
OUT_FEATURES = 1152


def _linear_kernel(x_ref, w_ref, b_ref, o_ref):
    # x_ref: (tm, K) bf16   -- streamed activation tile
    # w_ref: (K, N)  bf16   -- VMEM-resident full weight
    # b_ref: (1, N)  f32    -- VMEM-resident bias
    # o_ref: (tm, N) f32    -- lane-dense (N = 9 * 128) output tile
    acc = jnp.dot(x_ref[...], w_ref[...], preferred_element_type=jnp.float32)
    o_ref[...] = (acc + b_ref[...]).astype(o_ref.dtype)


def _round_up(x, m):
    return (x + m - 1) // m * m


def linear_pallas(x2d, weight, bias, *, tm=512):
    """x2d: (M, K) f32, weight: (K, N) f32, bias: (N,) f32 -> (M, N) f32."""
    M, K = x2d.shape
    K2, N = weight.shape
    assert K == K2 and N % 128 == 0

    # bf16 operands for the MXU (bf16-native on v5e/v6e/v7x, halves input DMA
    # bytes); accumulation stays f32 via preferred_element_type.
    xb = x2d.astype(jnp.bfloat16)
    wb = weight.astype(jnp.bfloat16)
    b2 = bias.reshape(1, N).astype(jnp.float32)

    # Tile over M only.  Pick the largest tile <= tm that doesn't force
    # excessive zero-padding for small M; pad rows (in bf16) so the grid
    # divides evenly.  VMEM use is O(tm), independent of M.
    tm = min(tm, _round_up(M, 8))
    m_pad = _round_up(M, tm)
    if m_pad != M:
        xb = jnp.pad(xb, ((0, m_pad - M), (0, 0)))

    flops = 2 * m_pad * K * N
    bytes_accessed = xb.size * 2 + wb.size * 2 + b2.size * 4 + m_pad * N * 4

    out = pl.pallas_call(
        _linear_kernel,
        out_shape=jax.ShapeDtypeStruct((m_pad, N), x2d.dtype),
        grid_spec=pltpu.PrefetchScalarGridSpec(
            num_scalar_prefetch=0,
            grid=(m_pad // tm,),
            in_specs=[
                pl.BlockSpec((tm, K), lambda i: (i, 0)),   # streamed activations
                pl.BlockSpec((K, N), lambda i: (0, 0)),    # resident weight
                pl.BlockSpec((1, N), lambda i: (0, 0)),    # resident bias
            ],
            out_specs=pl.BlockSpec((tm, N), lambda i: (i, 0)),
        ),
        compiler_params=pltpu.CompilerParams(
            dimension_semantics=("parallel",),
        ),
        cost_estimate=pl.CostEstimate(
            flops=flops, transcendentals=0, bytes_accessed=bytes_accessed),
    )(xb, wb, b2)

    return out[:M] if m_pad != M else out


def _linear_patch_embedding_impl(x, weight, bias):
    """Forward pass of LinearPatchEmbedding.

    x:      (B, C, H*14, W*14) float32, NCHW (PyTorch convention).
    weight: (588, 1152) float32 (nn.Linear weight already transposed to (in, out)).
    bias:   (1152,) float32.
    returns: (B, H*W, 1152) float32.
    """
    b, c, hp1, wp2 = x.shape
    h, w = hp1 // P1, wp2 // P2
    # Patchify (plain JAX glue): matches
    #   x.reshape(b,c,h,p1,w,p2).permute(0,2,4,1,3,5).reshape(b, h*w, c*p1*p2)
    # TODO(synk): for very large images this transpose is one extra HBM pass;
    # accept pre-patchified / NHWC input (or fuse patch gather into the input
    # DMA) to remove it.
    xp = x.reshape(b, c, h, P1, w, P2)
    xp = jnp.transpose(xp, (0, 2, 4, 1, 3, 5))
    xp = xp.reshape(b * h * w, c * P1 * P2)          # (M, 588)

    out = linear_pallas(xp, weight, bias)             # (M, 1152)
    return out.reshape(b, h * w, OUT_FEATURES)


# jit so the patchify transpose, casts, pad and pallas_call fuse into one
# compiled program (no extra host round-trips between them).
linear_patch_embedding = jax.jit(_linear_patch_embedding_impl)


def _reference(x, weight, bias):
    b, c, hp1, wp2 = x.shape
    h, w = hp1 // P1, wp2 // P2
    xp = x.reshape(b, c, h, P1, w, P2)
    xp = jnp.transpose(xp, (0, 2, 4, 1, 3, 5)).reshape(b, h * w, c * P1 * P2)
    return xp @ weight + bias


if __name__ == "__main__":
    key = jax.random.PRNGKey(0)
    kx, kw, kb = jax.random.split(key, 3)

    # Small shapes consistent with the module: c*14*14 must equal 588 -> c=3.
    B, C, H, W = 2, 3, 2 * P1, 2 * P2          # x: (2, 3, 28, 28), seq = 4
    x = jax.random.normal(kx, (B, C, H, W), dtype=jnp.float32)

    # nn.Linear(588, 1152) params, stored as (in, out) so the kernel does x @ W + b.
    weight = jax.random.normal(kw, (IN_FEATURES, OUT_FEATURES),
                               dtype=jnp.float32) * 0.02
    bias = jax.random.normal(kb, (OUT_FEATURES,), dtype=jnp.float32) * 0.02

    out = linear_patch_embedding(x, weight, bias)
    out = jax.block_until_ready(out)

    ref = _reference(x, weight, bias)
    assert out.shape == (B, 4, OUT_FEATURES), out.shape
    # bf16 operands (f32 accumulation) -> looser tolerance than pure-f32.
    assert jnp.allclose(out, ref, atol=3e-2, rtol=3e-2), "mismatch vs reference"

    print("KERNEL_OK")
</pallas_src>

<mosaic_0001>
module attributes {stable_mosaic.version = 11 : i64} {
  func.func @_linear_kernel(%arg0: i32, %arg1: memref<8x588xbf16, #tpu.memory_space<vmem>>, %arg2: memref<588x1152xbf16, #tpu.memory_space<vmem>>, %arg3: memref<1x1152xf32, #tpu.memory_space<vmem>>, %arg4: memref<8x1152xf32, #tpu.memory_space<vmem>>) attributes {dimension_semantics = [#tpu.dimension_semantics<parallel>], iteration_bounds = array<i64: 1>, scalar_prefetch = 0 : i64, scratch_operands = 0 : i64, tpu.core_type = #tpu.core_type<tc>, window_params = [{transform_indices = @transform_0, window_bounds = array<i64: 8, 588>}, {pipeline_mode = #tpu.pipeline_mode<synchronous>, transform_indices = @transform_1, window_bounds = array<i64: 588, 1152>}, {pipeline_mode = #tpu.pipeline_mode<synchronous>, transform_indices = @transform_2, window_bounds = array<i64: 1, 1152>}, {transform_indices = @transform_3, window_bounds = array<i64: 8, 1152>}]} {
    %c0 = arith.constant 0 : index
    %c0_0 = arith.constant 0 : index
    %0 = vector.load %arg1[%c0, %c0_0] : memref<8x588xbf16, #tpu.memory_space<vmem>>, vector<8x588xbf16>
    %c0_1 = arith.constant 0 : index
    %c0_2 = arith.constant 0 : index
    %1 = vector.load %arg2[%c0_1, %c0_2] : memref<588x1152xbf16, #tpu.memory_space<vmem>>, vector<588x1152xbf16>
    %cst = arith.constant dense<0.000000e+00> : vector<8x1152xf32>
    %2 = tpu.matmul %0, %1, %cst {dimension_numbers = #tpu.dot_dimension_numbers<[1], [0], [0], [1], [0, 0, 1, 1], [], []>} : vector<8x588xbf16>, vector<588x1152xbf16>, vector<8x1152xf32> -> vector<8x1152xf32>
    %c0_3 = arith.constant 0 : index
    %c0_4 = arith.constant 0 : index
    %3 = vector.load %arg3[%c0_3, %c0_4] : memref<1x1152xf32, #tpu.memory_space<vmem>>, vector<1x1152xf32>
    %4 = vector.broadcast %3 : vector<1x1152xf32> to vector<8x1152xf32>
    %5 = arith.addf %2, %4 : vector<8x1152xf32>
    %c0_5 = arith.constant 0 : index
    %c0_6 = arith.constant 0 : index
    %6 = vector.load %arg4[%c0_5, %c0_6] : memref<8x1152xf32, #tpu.memory_space<vmem>>, vector<8x1152xf32>
    tpu.vector_store %arg4[%c0_5, %c0_6], %5 {strides = array<i32>} : memref<8x1152xf32, #tpu.memory_space<vmem>>, vector<8x1152xf32>,
    return
  }
  func.func @transform_0(%arg0: i32) -> (i32, i32) {
    %c0_i32 = arith.constant 0 : i32
    %c0_i32_0 = arith.constant 0 : i32
    return %arg0, %c0_i32 : i32, i32
  }
  func.func @transform_1(%arg0: i32) -> (i32, i32) {
    %c0_i32 = arith.constant 0 : i32
    %c0_i32_0 = arith.constant 0 : i32
    %c0_i32_1 = arith.constant 0 : i32
    return %c0_i32, %c0_i32_0 : i32, i32
  }
  func.func @transform_2(%arg0: i32) -> (i32, i32) {
    %c0_i32 = arith.constant 0 : i32
    %c0_i32_0 = arith.constant 0 : i32
    %c0_i32_1 = arith.constant 0 : i32
    return %c0_i32, %c0_i32_0 : i32, i32
  }
  func.func @transform_3(%arg0: i32) -> (i32, i32) {
    %c0_i32 = arith.constant 0 : i32
    %c0_i32_0 = arith.constant 0 : i32
    return %arg0, %c0_i32 : i32, i32
  }
}

</mosaic_0001>

<bundles_post_ra>
// kernel: _linear_patch_embedding_impl.1
= control target key start
LH: loop header
LB: loop body
LE: loop exit
PB: predicated region body
PF: predicated region fallthrough
CT: control target
= control target key end

     0   :  { %vm2124_vm0 = vcmask 1045504   ;;  %vm2120_vm1 = vcmask 621568   ;;  %s6574_s1 = inlined_call_operand.vmem [shape: bf16[588,1152], index: 1, kind: input, shape index: {}]   ;;  %s6575_s0 = inlined_call_operand.vmem [shape: bf16[8,588], index: 0, kind: input, shape index: {}]   ;;  %s6576_s2 = inlined_call_operand.vmem [shape: f32[1,1152], index: 2, kind: input, shape index: {}]   ;;  %s6577_s3 = inlined_call_operand.vmem [shape: f32[8,1152], index: 3, kind: output, shape index: {}]  }
   0x1   :  { %v3004_v0 = vld [vmem:[%s6574_s1 + $0x1f8] sm:$0xf]  ;;  %v4158_v1 = vld [vmem:[%s6574_s1 + $0x218] sm:$0xf0]  ;;  %v2968_v11 = vld [vmem:[%s6574_s1 + $0x1b0] sm:$0xf] }
   0x2   :  { %v3580_v2 = vld [vmem:[%s6574_s1 + $0x678] sm:$0xf]  ;;  %v3005_v3 = vor.u32 %v4158_v1, %v3004_v0  ;;  %v4302_v4 = vld [vmem:[%s6574_s1 + $0x698] sm:$0xf0]  ;;  %v4149_v13 = vld [vmem:[%s6574_s1 + $0x1d0] sm:$0xf0] }
   0x3   :  { %v3868_v5 = vld [vmem:[%s6574_s1 + $0x8b8] sm:$0xf]  ;;  %v4374_v6 = vld [vmem:[%s6574_s1 + $0x8d8] sm:$0xf0]  ;;  %v3581_v7 = vor.u32 %v4302_v4, %v3580_v2  ;;  %v3544_v14 = vld [vmem:[%s6574_s1 + $0x630] sm:$0xf]  ;;  %v2969_v16 = vor.u32 %v4149_v13, %v2968_v11 }
   0x4   :  { %v3869_v8 = vor.u32 %v4374_v6, %v3868_v5  ;;  %v3292_v9 = vld [vmem:[%s6574_s1 + $0x438] sm:$0xf]  ;;  %v4230_v10 = vld [vmem:[%s6574_s1 + $0x458] sm:$0xf0]  ;;  %2152 = vmatpush.bf16.msra.mxu0 %v3005_v3  ;;  %v4293_v15 = vld [vmem:[%s6574_s1 + $0x650] sm:$0xf0] }
   0x5   :  { %v3293_v12 = vor.u32 %v4230_v10, %v3292_v9  ;;  %2178 = vmatpush.bf16.msra.mxu2 %v3581_v7  ;;  %v3545_v17 = vor.u32 %v4293_v15, %v3544_v14  ;;  %v3832_v18 = vld [vmem:[%s6574_s1 + $0x870] sm:$0xf]  ;;  %v4365_v19 = vld [vmem:[%s6574_s1 + $0x890] sm:$0xf0]  ;;  %v2932_v23 = vld [vmem:[%s6574_s1 + $0x168] sm:$0xf] }
   0x6   :  { %2191 = vmatpush.bf16.msra.mxu3 %v3869_v8  ;;  %v3256_v20 = vld [vmem:[%s6574_s1 + $0x3f0] sm:$0xf]  ;;  %v3833_v21 = vor.u32 %v4365_v19, %v3832_v18  ;;  %v4221_v22 = vld [vmem:[%s6574_s1 + $0x410] sm:$0xf0]  ;;  %v4140_v24 = vld [vmem:[%s6574_s1 + $0x188] sm:$0xf0] }
   0x7   :  { %2165 = vmatpush.bf16.msra.mxu1 %v3293_v12  ;;  %v3257_v25 = vor.u32 %v4221_v22, %v3256_v20  ;;  %v3508_v26 = vld [vmem:[%s6574_s1 + $0x5e8] sm:$0xf]  ;;  %v4284_v27 = vld [vmem:[%s6574_s1 + $0x608] sm:$0xf0]  ;;  %v2933_v29 = vor.u32 %v4140_v24, %v2932_v23  ;;  %v2896_v35 = vld [vmem:[%s6574_s1 + $0x120] sm:$0xf] }
   0x8   :  { %v3796_v28 = vld [vmem:[%s6574_s1 + $0x828] sm:$0xf]  ;;  %2153 = vmatpush.bf16.msra.mxu0 %v2969_v16  ;;  %v4356_v30 = vld [vmem:[%s6574_s1 + $0x848] sm:$0xf0]  ;;  %v3509_v33 = vor.u32 %v4284_v27, %v3508_v26  ;;  %v4131_v36 = vld [vmem:[%s6574_s1 + $0x140] sm:$0xf0] }
   0x9   :  { %v3220_v31 = vld [vmem:[%s6574_s1 + $0x3a8] sm:$0xf]  ;;  %v4212_v32 = vld [vmem:[%s6574_s1 + $0x3c8] sm:$0xf0]  ;;  %2179 = vmatpush.bf16.msra.mxu2 %v3545_v17  ;;  %v3797_v34 = vor.u32 %v4356_v30, %v3796_v28  ;;  %v3472_v37 = vld [vmem:[%s6574_s1 + $0x5a0] sm:$0xf]  ;;  %v2897_v44 = vor.u32 %v4131_v36, %v2896_v35 }
   0xa   :  { %2192 = vmatpush.bf16.msra.mxu3 %v3833_v21  ;;  %v3221_v38 = vor.u32 %v4212_v32, %v3220_v31  ;;  %v4275_v39 = vld [vmem:[%s6574_s1 + $0x5c0] sm:$0xf0]  ;;  %v3760_v40 = vld [vmem:[%s6574_s1 + $0x7e0] sm:$0xf]  ;;  %v2860_v47 = vld [vmem:[%s6574_s1 + $0xd8] sm:$0xf] }
   0xb   :  { %2166 = vmatpush.bf16.msra.mxu1 %v3257_v25  ;;  %v4347_v41 = vld [vmem:[%s6574_s1 + $0x800] sm:$0xf0]  ;;  %v3184_v42 = vld [vmem:[%s6574_s1 + $0x360] sm:$0xf]  ;;  %v3473_v45 = vor.u32 %v4275_v39, %v3472_v37  ;;  %v4122_v48 = vld [vmem:[%s6574_s1 + $0xf8] sm:$0xf0] }
   0xc   :  { %v4203_v43 = vld [vmem:[%s6574_s1 + $0x380] sm:$0xf0]  ;;  %2154 = vmatpush.bf16.msra.mxu0 %v2933_v29  ;;  %v3761_v46 = vor.u32 %v4347_v41, %v3760_v40  ;;  %v3436_v49 = vld [vmem:[%s6574_s1 + $0x558] sm:$0xf]  ;;  %v4266_v51 = vld [vmem:[%s6574_s1 + $0x578] sm:$0xf0]  ;;  %v2861_v56 = vor.u32 %v4122_v48, %v2860_v47 }
   0xd   :  { %2180 = vmatpush.bf16.msra.mxu2 %v3509_v33  ;;  %v3185_v50 = vor.u32 %v4203_v43, %v3184_v42  ;;  %v3724_v52 = vld [vmem:[%s6574_s1 + $0x798] sm:$0xf]  ;;  %v4338_v53 = vld [vmem:[%s6574_s1 + $0x7b8] sm:$0xf0]  ;;  %v3437_v57 = vor.u32 %v4266_v51, %v3436_v49  ;;  %v2824_v59 = vld [vmem:[%s6574_s1 + $0x90] sm:$0xf] }
   0xe   :  { %2193 = vmatpush.bf16.msra.mxu3 %v3797_v34  ;;  %v3148_v54 = vld [vmem:[%s6574_s1 + $0x318] sm:$0xf]  ;;  %v4194_v55 = vld [vmem:[%s6574_s1 + $0x338] sm:$0xf0]  ;;  %v3725_v58 = vor.u32 %v4338_v53, %v3724_v52  ;;  %v4113_v60 = vld [vmem:[%s6574_s1 + $0xb0] sm:$0xf0] }
   0xf   :  { %2167 = vmatpush.bf16.msra.mxu1 %v3221_v38  ;;  %v3400_v61 = vld [vmem:[%s6574_s1 + $0x510] sm:$0xf]  ;;  %v3149_v62 = vor.u32 %v4194_v55, %v3148_v54  ;;  %v4257_v63 = vld [vmem:[%s6574_s1 + $0x530] sm:$0xf0]  ;;  %v2825_v4 = vor.u32 %v4113_v60, %v2824_v59  ;;  %v2788_v5 = vld [vmem:[%s6574_s1 + $0x48] sm:$0xf] }
  0x10   :  { %2155 = vmatpush.bf16.msra.mxu0 %v2897_v44  ;;  %v3688_v0 = vld [vmem:[%s6574_s1 + $0x750] sm:$0xf]  ;;  %v4329_v1 = vld [vmem:[%s6574_s1 + $0x770] sm:$0xf0]  ;;  %v3401_v6 = vor.u32 %v4257_v63, %v3400_v61  ;;  %v4104_v8 = vld [vmem:[%s6574_s1 + $0x68] sm:$0xf0] }
  0x11   :  { %2181 = vmatpush.bf16.msra.mxu2 %v3473_v45  ;;  %v3112_v2 = vld [vmem:[%s6574_s1 + $0x2d0] sm:$0xf]  ;;  %v4185_v3 = vld [vmem:[%s6574_s1 + $0x2f0] sm:$0xf0]  ;;  %v3689_v7 = vor.u32 %v4329_v1, %v3688_v0  ;;  %v3364_v9 = vld [vmem:[%s6574_s1 + $0x4c8] sm:$0xf]  ;;  %v2789_v18 = vor.u32 %v4104_v8, %v2788_v5 }
  0x12   :  { %2194 = vmatpush.bf16.msra.mxu3 %v3761_v46  ;;  %v4248_v10 = vld [vmem:[%s6574_s1 + $0x4e8] sm:$0xf0]  ;;  %v3113_v11 = vor.u32 %v4185_v3, %v3112_v2  ;;  %v3652_v12 = vld [vmem:[%s6574_s1 + $0x708] sm:$0xf]  ;;  %v4048_v16 = vld [vmem:[%s6574_s1 + $0xa20] sm:$0xf] }
  0x13   :  { %2168 = vmatpush.bf16.msra.mxu1 %v3185_v50  ;;  %v4320_v13 = vld [vmem:[%s6574_s1 + $0x728] sm:$0xf0]  ;;  %v3076_v14 = vld [vmem:[%s6574_s1 + $0x288] sm:$0xf]  ;;  %v4419_v17 = vld [vmem:[%s6574_s1 + $0xa40] sm:$0x30]  ;;  %v3365_v20 = vor.u32 %v4248_v10, %v3364_v9 }
  0x14   :  { %2156 = vmatpush.bf16.msra.mxu0 %v2861_v56  ;;  %v4176_v15 = vld [vmem:[%s6574_s1 + $0x2a8] sm:$0xf0]  ;;  %v2752_v19 = vld [vmem:[%s6574_s1] sm:$0xf]  ;;  %v3653_v21 = vor.u32 %v4320_v13, %v3652_v12  ;;  %v4095_v22 = vld [vmem:[%s6574_s1 + $0x20] sm:$0xf0]  ;;  %v4049_v27 = vor.u32 %v4419_v17, %v4048_v16 }
  0x15   :  { %2182 = vmatpush.bf16.msra.mxu2 %v3437_v57  ;;  %v3328_v23 = vld [vmem:[%s6574_s1 + $0x480] sm:$0xf]  ;;  %v3077_v25 = vor.u32 %v4176_v15, %v3076_v14  ;;  %v4239_v26 = vld [vmem:[%s6574_s1 + $0x4a0] sm:$0xf0]  ;;  %v4226_v28 = vld [vmem:[%s6574_s1 + $0x43c] sm:$0xf]  ;;  %v2753_v33 = vor.u32 %v4095_v22, %v2752_v19 }
  0x16   :  { %2195 = vmatpush.bf16.msra.mxu3 %v3725_v58  ;;  %v15_v24 = vld [vmem:[%s6575_s0] sm:$0xff]  ;;  %v4298_v35 = vld [vmem:[%s6574_s1 + $0x67c] sm:$0xf]  ;;  %v3329_v38 = vor.u32 %v4239_v26, %v3328_v23  ;;  %v2126_v41 = vsel %vm2124_vm0, %v4049_v27, 0  ;;  %v4012_v44 = vld [vmem:[%s6574_s1 + $0x9d8] sm:$0xf] }
  0x17   :  { %2169 = vmatpush.bf16.msra.mxu1 %v3149_v62  ;;  %v3294_v29 = vld [vmem:[%s6574_s1 + $0x45c] sm:$0xf0]  ;;  %v4311_v31 = vld [vmem:[%s6574_s1 + $0x6e0] sm:$0xf0]  ;;  %v413_v37 = vunpack.c.l.b16 %v15_v24  ;;  %v4154_v39 = vld [vmem:[%s6574_s1 + $0x1fc] sm:$0xf]  ;;  %v414_v50 = vunpack.c.h.b16 %v15_v24 }
  0x18   :  { %2157 = vmatpush.bf16.msra.mxu0 %v2825_v4  ;;  %v3616_v30 = vld [vmem:[%s6574_s1 + $0x6c0] sm:$0xf]  ;;  %v4167_v34 = vld [vmem:[%s6574_s1 + $0x260] sm:$0xf0]  ;;  %v3297_v42 = vor.u32 %v4226_v28, %v3294_v29  ;;  %v4410_v45 = vld [vmem:[%s6574_s1 + $0x9f8] sm:$0xf0] }
  0x19   :  { %2183 = vmatpush.bf16.msra.mxu2 %v3401_v6  ;;  %v3040_v32 = vld [vmem:[%s6574_s1 + $0x240] sm:$0xf]  ;;  %v3617_v43 = vor.u32 %v4311_v31, %v3616_v30  ;;  %v4217_v48 = vld [vmem:[%s6574_s1 + $0x3f4] sm:$0xf]  ;;  %v3258_v49 = vld [vmem:[%s6574_s1 + $0x414] sm:$0xf0]  ;;  %v4684_v54 = vpack.c.b16 %v413_v37, %v413_v37  ;;  %v4013_v56 = vor.u32 %v4410_v45, %v4012_v44  ;;  %v4709_v4 = vpack.c.b16 %v414_v50, %v414_v50 }
  0x1a   :  { %2196 = vmatpush.bf16.msra.mxu3 %v3689_v7  ;;  %v3582_v36 = vld [vmem:[%s6574_s1 + $0x69c] sm:$0xf0]  ;;  %v3041_v46 = vor.u32 %v4167_v34, %v3040_v32  ;;  %v4289_v52 = vld [vmem:[%s6574_s1 + $0x634] sm:$0xf]  ;;  %v3546_v53 = vld [vmem:[%s6574_s1 + $0x654] sm:$0xf0]  ;;  %v3261_v61 = vor.u32 %v4217_v48, %v3258_v49 }
  0x1b   :  { %2170 = vmatpush.bf16.msra.mxu1 %v3113_v11  ;;  %v3006_v40 = vld [vmem:[%s6574_s1 + $0x21c] sm:$0xf0]  ;;  %v3585_v47 = vor.u32 %v4298_v35, %v3582_v36  ;;  %v16_v55 = vld [vmem:[%s6575_s0 + $0x8] sm:$0xff]  ;;  %v4145_v57 = vld [vmem:[%s6574_s1 + $0x1b4] sm:$0xf]  ;;  %v3549_v0 = vor.u32 %v4289_v52, %v3546_v53 }
  0x1c   :  { %2158 = vmatpush.bf16.msra.mxu0 %v2789_v18  ;;  %v3009_v51 = vor.u32 %v4154_v39, %v3006_v40  ;;  %v2970_v58 = vld [vmem:[%s6574_s1 + $0x1d4] sm:$0xf0]  ;;  %v415_v59 = vunpack.c.l.b16 %v16_v55  ;;  %v416_v60 = vunpack.c.h.b16 %v16_v55  ;;  %v3976_v62 = vld [vmem:[%s6574_s1 + $0x990] sm:$0xf]  ;;  %v4401_v63 = vld [vmem:[%s6574_s1 + $0x9b0] sm:$0xf0] }
  0x1d   :  { %2184 = vmatpush.bf16.msra.mxu2 %v3365_v20  ;;  %v4208_v1 = vld [vmem:[%s6574_s1 + $0x3ac] sm:$0xf]  ;;  %v3222_v2 = vld [vmem:[%s6574_s1 + $0x3cc] sm:$0xf0]  ;;  %v2973_v5 = vor.u32 %v4145_v57, %v2970_v58  ;;  %v3977_v9 = vor.u32 %v4401_v63, %v3976_v62  ;;  %v3940_v13 = vld [vmem:[%s6574_s1 + $0x948] sm:$0xf] }
  0x1e   :  { %2197 = vmatpush.bf16.msra.mxu3 %v3653_v21  ;;  %v4707_v3 = vpack.c.b16 %v415_v59, %v415_v59  ;;  %v4280_v6 = vld [vmem:[%s6574_s1 + $0x5ec] sm:$0xf]  ;;  %v3510_v7 = vld [vmem:[%s6574_s1 + $0x60c] sm:$0xf0]  ;;  %v4718_v8 = vpack.c.b16 %v416_v60, %v416_v60  ;;  %v3225_v12 = vor.u32 %v4208_v1, %v3222_v2  ;;  %v4199_v16 = vld [vmem:[%s6574_s1 + $0x364] sm:$0xf] }
  0x1f   :  { %2171 = vmatpush.bf16.msra.mxu1 %v3077_v25  ;;  %v4136_v10 = vld [vmem:[%s6574_s1 + $0x16c] sm:$0xf]  ;;  %v2934_v11 = vld [vmem:[%s6574_s1 + $0x18c] sm:$0xf0]  ;;  %v3513_v15 = vor.u32 %v4280_v6, %v3510_v7  ;;  %v3186_v17 = vld [vmem:[%s6574_s1 + $0x384] sm:$0xf0] }
  0x20   :  { %2159 = vmatpush.bf16.msra.mxu0 %v2753_v33  ;;  %v4392_v14 = vld [vmem:[%s6574_s1 + $0x968] sm:$0xf0]  ;;  %v2937_v18 = vor.u32 %v4136_v10, %v2934_v11  ;;  %v4271_v19 = vld [vmem:[%s6574_s1 + $0x5a4] sm:$0xf]  ;;  %v3474_v20 = vld [vmem:[%s6574_s1 + $0x5c4] sm:$0xf0]  ;;  %v3189_v25 = vor.u32 %v4199_v16, %v3186_v17 }
  0x21   :  { %2185 = vmatpush.bf16.msra.mxu2 %v3329_v38  ;;  %v3941_v21 = vor.u32 %v4392_v14, %v3940_v13  ;;  %v4127_v22 = vld [vmem:[%s6574_s1 + $0x124] sm:$0xf]  ;;  %v2898_v23 = vld [vmem:[%s6574_s1 + $0x144] sm:$0xf0]  ;;  %v17_v24 = vld [vmem:[%s6575_s0 + $0x10] sm:$0xf]  ;;  %v3477_v29 = vor.u32 %v4271_v19, %v3474_v20 }
  0x22   :  { %2198 = vmatpush.bf16.msra.mxu3 %v3617_v43  ;;  %v3904_v26 = vld [vmem:[%s6574_s1 + $0x900] sm:$0xf]  ;;  %v4383_v27 = vld [vmem:[%s6574_s1 + $0x920] sm:$0xf0]  ;;  %v4190_v28 = vld [vmem:[%s6574_s1 + $0x31c] sm:$0xf]  ;;  %v2901_v33 = vor.u32 %v4127_v22, %v2898_v23  ;;  %v417_v36 = vunpack.c.l.b16 %v17_v24 }
  0x23   :  { %2172 = vmatpush.bf16.msra.mxu1 %v3041_v46  ;;  %2160 = vmatmul.bf16.vlgmr.msra.gmra.mxu0 %v4684_v54  ;;  %v3150_v30 = vld [vmem:[%s6574_s1 + $0x33c] sm:$0xf0]  ;;  %v4370_v31 = vld [vmem:[%s6574_s1 + $0x8bc] sm:$0xf]  ;;  %v3905_v37 = vor.u32 %v4383_v27, %v3904_v26  ;;  %v3114_v44 = vld [vmem:[%s6574_s1 + $0x2f4] sm:$0xf0] }
  0x24   :  { %2207 = vmatpush.bf16.msrb.mxu0 %v2126_v41  ;;  %2186 = vmatmul.bf16.vlgmr.msra.gmra.mxu2 %v4707_v3  ;;  %v3870_v32 = vld [vmem:[%s6574_s1 + $0x8dc] sm:$0xf0]  ;;  %v4262_v34 = vld [vmem:[%s6574_s1 + $0x55c] sm:$0xf]  ;;  %v3153_v40 = vor.u32 %v4190_v28, %v3150_v30  ;;  %v4361_v45 = vld [vmem:[%s6574_s1 + $0x874] sm:$0xf]  ;;  %v4804_v50 = vpack.c.b16 %v417_v36, %v417_v36 }
  0x25   :  { %2230 = vmatpush.bf16.msrb.mxu2 %v3297_v42  ;;  %2199 = vmatmul.bf16.vlgmr.msra.gmra.mxu3 %v4718_v8  ;;  %v3438_v35 = vld [vmem:[%s6574_s1 + $0x57c] sm:$0xf0]  ;;  %v4118_v38 = vld [vmem:[%s6574_s1 + $0xdc] sm:$0xf]  ;;  %v3873_v41 = vor.u32 %v4370_v31, %v3870_v32  ;;  %v4181_v42 = vld [vmem:[%s6574_s1 + $0x2d4] sm:$0xf] }
  0x26   :  { %2243 = vmatpush.bf16.msrb.mxu3 %v3585_v47  ;;  %2173 = vmatmul.bf16.vlgmr.msra.gmra.mxu1 %v4709_v4  ;;  %v2862_v39 = vld [vmem:[%s6574_s1 + $0xfc] sm:$0xf0]  ;;  %v3441_v43 = vor.u32 %v4262_v34, %v3438_v35  ;;  %v3834_v46 = vld [vmem:[%s6574_s1 + $0x894] sm:$0xf0]  ;;  %v4253_v48 = vld [vmem:[%s6574_s1 + $0x514] sm:$0xf]  ;;  %v3117_v53 = vor.u32 %v4181_v42, %v3114_v44 }
  0x27   :  { %2217 = vmatpush.bf16.msrb.mxu1 %v3009_v51  ;;  %v2865_v47 = vor.u32 %v4118_v38, %v2862_v39  ;;  %v3402_v49 = vld [vmem:[%s6574_s1 + $0x534] sm:$0xf0]  ;;  %v4109_v51 = vld [vmem:[%s6574_s1 + $0x94] sm:$0xf]  ;;  %v3837_v55 = vor.u32 %v4361_v45, %v3834_v46  ;;  %v3078_v58 = vld [vmem:[%s6574_s1 + $0x2ac] sm:$0xf0] }
  0x28   :  { %2208 = vmatpush.bf16.msrb.mxu0 %v4013_v56  ;;  %v2826_v52 = vld [vmem:[%s6574_s1 + $0xb4] sm:$0xf0]  ;;  %v4172_v56 = vld [vmem:[%s6574_s1 + $0x28c] sm:$0xf]  ;;  %v3405_v57 = vor.u32 %v4253_v48, %v3402_v49  ;;  %v3798_v60 = vld [vmem:[%s6574_s1 + $0x84c] sm:$0xf0] }
  0x29   :  { %2231 = vmatpush.bf16.msrb.mxu2 %v3261_v61  ;;  %v4352_v59 = vld [vmem:[%s6574_s1 + $0x82c] sm:$0xf]  ;;  %v2829_v61 = vor.u32 %v4109_v51, %v2826_v52  ;;  %v3366_v63 = vld [vmem:[%s6574_s1 + $0x4ec] sm:$0xf0]  ;;  %v4163_v2 = vld [vmem:[%s6574_s1 + $0x244] sm:$0xf]  ;;  %v3081_v6 = vor.u32 %v4172_v56, %v3078_v58 }
  0x2a   :  { %2244 = vmatpush.bf16.msrb.mxu3 %v3549_v0  ;;  %v4244_v62 = vld [vmem:[%s6574_s1 + $0x4cc] sm:$0xf]  ;;  %v2790_v1 = vld [vmem:[%s6574_s1 + $0x6c] sm:$0xf0]  ;;  %v3801_v7 = vor.u32 %v4352_v59, %v3798_v60  ;;  %v3762_v10 = vld [vmem:[%s6574_s1 + $0x804] sm:$0xf0] }
  0x2b   :  { %2218 = vmatpush.bf16.msrb.mxu1 %v2973_v5  ;;  %v4100_v0 = vld [vmem:[%s6574_s1 + $0x4c] sm:$0xf]  ;;  %v3042_v5 = vld [vmem:[%s6574_s1 + $0x264] sm:$0xf0]  ;;  %v3012_v11 = vld [vmem:[%s6574_s1 + $0x200] sm:$0xf] }
  0x2c   :  { %2209 = vmatpush.bf16.msrb.mxu0 %v3977_v9  ;;  %v4343_v9 = vld [vmem:[%s6574_s1 + $0x7e4] sm:$0xf]  ;;  %v2793_v16 = vor.u32 %v4100_v0, %v2790_v1  ;;  %v2754_v20 = vld [vmem:[%s6574_s1 + $0x24] sm:$0xf0]  ;;  %v3045_v23 = vor.u32 %v4163_v2, %v3042_v5  ;;  %v4334_v28 = vld [vmem:[%s6574_s1 + $0x79c] sm:$0xf] }
  0x2d   :  { %2232 = vmatpush.bf16.msrb.mxu2 %v3225_v12  ;;  %v3369_v12 = vor.u32 %v4244_v62, %v3366_v63  ;;  %v4159_v13 = vld [vmem:[%s6574_s1 + $0x220] sm:$0xf0]  ;;  %v3765_v24 = vor.u32 %v4343_v9, %v3762_v10  ;;  %v2976_v32 = vld [vmem:[%s6574_s1 + $0x1b8] sm:$0xf]  ;;  %v4222_v35 = vld [vmem:[%s6574_s1 + $0x418] sm:$0xf0] }
  0x2e   :  { %2245 = vmatpush.bf16.msrb.mxu3 %v3513_v15  ;;  %v4415_v14 = vld [vmem:[%s6574_s1 + $0xa24] sm:$0xf]  ;;  %v4050_v15 = vld [vmem:[%s6574_s1 + $0xa44] sm:$0x30]  ;;  %v3013_v26 = vor.u32 %v4159_v13, %v3012_v11  ;;  %v3264_v34 = vld [vmem:[%s6574_s1 + $0x3f8] sm:$0xf] }
  0x2f   :  { %2219 = vmatpush.bf16.msrb.mxu1 %v2937_v18  ;;  %v4235_v17 = vld [vmem:[%s6574_s1 + $0x484] sm:$0xf]  ;;  %v3330_v18 = vld [vmem:[%s6574_s1 + $0x4a4] sm:$0xf0]  ;;  %v4406_v38 = vld [vmem:[%s6574_s1 + $0x9dc] sm:$0xf] }
  0x30   :  { %2210 = vmatpush.bf16.msrb.mxu0 %v3941_v21  ;;  %v4091_v19 = vld [vmem:[%s6574_s1 + $0x4] sm:$0xf]  ;;  %v3300_v21 = vld [vmem:[%s6574_s1 + $0x440] sm:$0xf]  ;;  %v3333_v27 = vor.u32 %v4235_v17, %v3330_v18  ;;  %v3690_v42 = vld [vmem:[%s6574_s1 + $0x774] sm:$0xf0] }
  0x31   :  { %2233 = vmatpush.bf16.msrb.mxu2 %v3189_v25  ;;  %v4231_v22 = vld [vmem:[%s6574_s1 + $0x460] sm:$0xf0]  ;;  %v4053_v25 = vor.u32 %v4415_v14, %v4050_v15  ;;  %v2757_v30 = vor.u32 %v4091_v19, %v2754_v20  ;;  %v4014_v39 = vld [vmem:[%s6574_s1 + $0x9fc] sm:$0xf0]  ;;  %v2940_v44 = vld [vmem:[%s6574_s1 + $0x170] sm:$0xf] }
  0x32   :  { %2246 = vmatpush.bf16.msrb.mxu3 %v3477_v29  ;;  %v3726_v29 = vld [vmem:[%s6574_s1 + $0x7bc] sm:$0xf0]  ;;  %v3301_v31 = vor.u32 %v4231_v22, %v3300_v21  ;;  %v4141_v45 = vld [vmem:[%s6574_s1 + $0x190] sm:$0xf0]  ;;  %v4017_v46 = vor.u32 %v4406_v38, %v4014_v39  ;;  %v3978_v52 = vld [vmem:[%s6574_s1 + $0x9b4] sm:$0xf0] }
  0x33   :  { %2220 = vmatpush.bf16.msrb.mxu1 %v2901_v33  ;;  %v4150_v33 = vld [vmem:[%s6574_s1 + $0x1d8] sm:$0xf0]  ;;  %v2129_v36 = vsel %vm2124_vm0, %v4053_v25, 0  ;;  %v4213_v48 = vld [vmem:[%s6574_s1 + $0x3d0] sm:$0xf0] }
  0x34   :  { %2211 = vmatpush.bf16.msrb.mxu0 %v3905_v37  ;;  %v3729_v37 = vor.u32 %v4334_v28, %v3726_v29  ;;  %v4397_v51 = vld [vmem:[%s6574_s1 + $0x994] sm:$0xf]  ;;  %v3654_v56 = vld [vmem:[%s6574_s1 + $0x72c] sm:$0xf0]  ;;  %v2904_v58 = vld [vmem:[%s6574_s1 + $0x128] sm:$0xf] }
  0x35   :  { %2234 = vmatpush.bf16.msrb.mxu2 %v3153_v40  ;;  %v2977_v40 = vor.u32 %v4150_v33, %v2976_v32  ;;  %v4132_v59 = vld [vmem:[%s6574_s1 + $0x148] sm:$0xf0]  ;;  %v3981_v60 = vor.u32 %v4397_v51, %v3978_v52  ;;  %v3942_v1 = vld [vmem:[%s6574_s1 + $0x96c] sm:$0xf0]  ;;  %v4307_v5 = vld [vmem:[%s6574_s1 + $0x6c4] sm:$0xf] }
  0x36   :  { %2247 = vmatpush.bf16.msrb.mxu3 %v3441_v43  ;;  %v3265_v43 = vor.u32 %v4222_v35, %v3264_v34  ;;  %v4204_v62 = vld [vmem:[%s6574_s1 + $0x388] sm:$0xf0]  ;;  %v2905_v2 = vor.u32 %v4132_v59, %v2904_v58  ;;  %v4123_v10 = vld [vmem:[%s6574_s1 + $0x100] sm:$0xf0]  ;;  %v3588_v11 = vld [vmem:[%s6574_s1 + $0x680] sm:$0xf] }
  0x37   :  { %2221 = vmatpush.bf16.msrb.mxu1 %v2865_v47  ;;  %4082 = vmatmul.msk.bf16.vlgmr.msrb.gmra.mxu0 %vm2120_vm1, %v4804_v50  ;;  %v3228_v47 = vld [vmem:[%s6574_s1 + $0x3b0] sm:$0xf]  ;;  %v4388_v0 = vld [vmem:[%s6574_s1 + $0x94c] sm:$0xf]  ;;  %v3156_v14 = vld [vmem:[%s6574_s1 + $0x320] sm:$0xf] }
  0x38   :  { %2256 = vmatpush.bf16.msra.mxu0 %v3873_v41  ;;  %v4325_v41 = vld [vmem:[%s6574_s1 + $0x754] sm:$0xf]  ;;  %v3945_v13 = vor.u32 %v4388_v0, %v3942_v1  ;;  %v4195_v15 = vld [vmem:[%s6574_s1 + $0x340] sm:$0xf0]  ;;  %v3906_v18 = vld [vmem:[%s6574_s1 + $0x924] sm:$0xf0] }
  0x39   :  { %2235 = vmatpush.bf16.msrb.mxu2 %v3117_v53  ;;  %v3693_v49 = vor.u32 %v4325_v41, %v3690_v42  ;;  %v2941_v53 = vor.u32 %v4141_v45, %v2940_v44  ;;  %v4379_v17 = vld [vmem:[%s6574_s1 + $0x904] sm:$0xf]  ;;  %v2832_v21 = vld [vmem:[%s6574_s1 + $0x98] sm:$0xf]  ;;  %v3876_v22 = vld [vmem:[%s6574_s1 + $0x8c0] sm:$0xf] }
  0x3a   :  { %2248 = vmatpush.bf16.msrb.mxu3 %v3405_v57  ;;  %v3229_v57 = vor.u32 %v4213_v48, %v3228_v47  ;;  %v4114_v25 = vld [vmem:[%s6574_s1 + $0xb8] sm:$0xf0]  ;;  %v3909_v28 = vor.u32 %v4379_v17, %v3906_v18  ;;  %v3120_v29 = vld [vmem:[%s6574_s1 + $0x2d8] sm:$0xf]  ;;  %v2796_v34 = vld [vmem:[%s6574_s1 + $0x50] sm:$0xf] }
  0x3b   :  { %2222 = vmatpush.bf16.msrb.mxu1 %v2829_v61  ;;  %v3192_v61 = vld [vmem:[%s6574_s1 + $0x368] sm:$0xf]  ;;  %v2833_v32 = vor.u32 %v4114_v25, %v2832_v21  ;;  %v3840_v35 = vld [vmem:[%s6574_s1 + $0x878] sm:$0xf]  ;;  %v4105_v38 = vld [vmem:[%s6574_s1 + $0x70] sm:$0xf0] }
  0x3c   :  { %2257 = vmatpush.bf16.msra.mxu0 %v3837_v55  ;;  %v4316_v55 = vld [vmem:[%s6574_s1 + $0x70c] sm:$0xf]  ;;  %v3193_v9 = vor.u32 %v4204_v62, %v3192_v61  ;;  %v3516_v39 = vld [vmem:[%s6574_s1 + $0x5f0] sm:$0xf]  ;;  %v4177_v42 = vld [vmem:[%s6574_s1 + $0x2b0] sm:$0xf0] }
  0x3d   :  { %2236 = vmatpush.bf16.msrb.mxu2 %v3081_v6  ;;  %v3657_v63 = vor.u32 %v4316_v55, %v3654_v56  ;;  %v3618_v6 = vld [vmem:[%s6574_s1 + $0x6e4] sm:$0xf0]  ;;  %v3084_v41 = vld [vmem:[%s6574_s1 + $0x290] sm:$0xf]  ;;  %v4420_v45 = vld [vmem:[%s6574_s1 + $0xa48] sm:$0x30] }
  0x3e   :  { %2249 = vmatpush.bf16.msrb.mxu3 %v3369_v12  ;;  %v4303_v12 = vld [vmem:[%s6574_s1 + $0x6a0] sm:$0xf0]  ;;  %v4056_v44 = vld [vmem:[%s6574_s1 + $0xa28] sm:$0xf]  ;;  %v4357_v51 = vld [vmem:[%s6574_s1 + $0x850] sm:$0xf0]  ;;  %v3085_v52 = vor.u32 %v4177_v42, %v3084_v41 }
  0x3f   :  { %2223 = vmatpush.bf16.msrb.mxu1 %v2793_v16  ;;  %v3621_v16 = vor.u32 %v4307_v5, %v3618_v6  ;;  %v3589_v20 = vor.u32 %v4303_v12, %v3588_v11  ;;  %v2760_v48 = vld [vmem:[%s6574_s1 + $0x8] sm:$0xf]  ;;  %v4276_v56 = vld [vmem:[%s6574_s1 + $0x5c8] sm:$0xf0]  ;;  %v4155_v61 = vld [vmem:[%s6574_s1 + $0x204] sm:$0xf] }
  0x40   :  { %2258 = vmatpush.bf16.msra.mxu0 %v3801_v7  ;;  %v2868_v7 = vld [vmem:[%s6574_s1 + $0xe0] sm:$0xf]  ;;  %v3480_v55 = vld [vmem:[%s6574_s1 + $0x5a8] sm:$0xf]  ;;  %v4168_v59 = vld [vmem:[%s6574_s1 + $0x268] sm:$0xf0] }
  0x41   :  { %2237 = vmatpush.bf16.msrb.mxu2 %v3045_v23  ;;  %v2869_v19 = vor.u32 %v4123_v10, %v2868_v7  ;;  %v4375_v23 = vld [vmem:[%s6574_s1 + $0x8e0] sm:$0xf0]  ;;  %v3048_v58 = vld [vmem:[%s6574_s1 + $0x248] sm:$0xf]  ;;  %v3481_v0 = vor.u32 %v4276_v56, %v3480_v55  ;;  %v3444_v6 = vld [vmem:[%s6574_s1 + $0x560] sm:$0xf] }
  0x42   :  { %2250 = vmatpush.bf16.msrb.mxu3 %v3333_v27  ;;  %v4294_v27 = vld [vmem:[%s6574_s1 + $0x658] sm:$0xf0]  ;;  %v3014_v62 = vld [vmem:[%s6574_s1 + $0x224] sm:$0xf0]  ;;  %v3049_v5 = vor.u32 %v4168_v59, %v3048_v58  ;;  %v4267_v7 = vld [vmem:[%s6574_s1 + $0x580] sm:$0xf0] }
  0x43   :  { %2224 = vmatpush.bf16.msrb.mxu1 %v2757_v30  ;;  %v4186_v30 = vld [vmem:[%s6574_s1 + $0x2f8] sm:$0xf0]  ;;  %v3768_v1 = vld [vmem:[%s6574_s1 + $0x7e8] sm:$0xf]  ;;  %v3017_v10 = vor.u32 %v4155_v61, %v3014_v62  ;;  %v4020_v11 = vld [vmem:[%s6574_s1 + $0x9e0] sm:$0xf] }
  0x44   :  { %2259 = vmatpush.bf16.msra.mxu0 %v3765_v24  ;;  %2238 = vmatmul.bf16.vlgmr.msrb.gmra.mxu2 %v4709_v4  ;;  %v3157_v24 = vor.u32 %v4195_v15, %v3156_v14  ;;  %v4411_v12 = vld [vmem:[%s6574_s1 + $0xa00] sm:$0xf0]  ;;  %v4146_v14 = vld [vmem:[%s6574_s1 + $0x1bc] sm:$0xf]  ;;  %v2978_v15 = vld [vmem:[%s6574_s1 + $0x1dc] sm:$0xf0] }
  0x45   :  { %2282 = vmatpush.bf16.msra.mxu2 %v3013_v26  ;;  %2251 = vmatmul.bf16.vlgmr.msrb.gmra.mxu3 %v4707_v3  ;;  %v3552_v26 = vld [vmem:[%s6574_s1 + $0x638] sm:$0xf]  ;;  %v3732_v17 = vld [vmem:[%s6574_s1 + $0x7a0] sm:$0xf]  ;;  %v4339_v18 = vld [vmem:[%s6574_s1 + $0x7c0] sm:$0xf0] }
  0x46   :  { %2295 = vmatpush.bf16.msra.mxu3 %v3301_v31  ;;  %2225 = vmatmul.bf16.vlgmr.msrb.gmra.mxu1 %v4684_v54  ;;  %v3877_v31 = vor.u32 %v4375_v23, %v3876_v22  ;;  %v3553_v33 = vor.u32 %v4294_v27, %v3552_v26  ;;  %v4258_v21 = vld [vmem:[%s6574_s1 + $0x538] sm:$0xf0]  ;;  %v2981_v22 = vor.u32 %v4146_v14, %v2978_v15  ;;  %v3984_v23 = vld [vmem:[%s6574_s1 + $0x998] sm:$0xf]  ;;  %v4137_v26 = vld [vmem:[%s6574_s1 + $0x174] sm:$0xf] }
  0x47   :  { %2272 = vmatpush.bf16.msra.mxu1 %v2129_v36  ;;  %v4366_v36 = vld [vmem:[%s6574_s1 + $0x898] sm:$0xf0]  ;;  %v3733_v25 = vor.u32 %v4339_v18, %v3732_v17  ;;  %v2942_v27 = vld [vmem:[%s6574_s1 + $0x194] sm:$0xf0]  ;;  %v3660_v41 = vld [vmem:[%s6574_s1 + $0x710] sm:$0xf] }
  0x48   :  { %2260 = vmatpush.bf16.msra.mxu0 %v3729_v37  ;;  %v3121_v37 = vor.u32 %v4186_v30, %v3120_v29  ;;  %v3696_v29 = vld [vmem:[%s6574_s1 + $0x758] sm:$0xf]  ;;  %v4330_v30 = vld [vmem:[%s6574_s1 + $0x778] sm:$0xf0]  ;;  %v4321_v42 = vld [vmem:[%s6574_s1 + $0x730] sm:$0xf0] }
  0x49   :  { %2283 = vmatpush.bf16.msra.mxu2 %v2977_v40  ;;  %v4285_v40 = vld [vmem:[%s6574_s1 + $0x610] sm:$0xf0]  ;;  %v3878_v55 = vld [vmem:[%s6574_s1 + $0x8e4] sm:$0xf0]  ;;  %v4119_v56 = vld [vmem:[%s6574_s1 + $0xe4] sm:$0xf] }
  0x4a   :  { %2296 = vmatpush.bf16.msra.mxu3 %v3265_v43  ;;  %v3841_v43 = vor.u32 %v4366_v36, %v3840_v35  ;;  %v3517_v47 = vor.u32 %v4285_v40, %v3516_v39  ;;  %v3948_v35 = vld [vmem:[%s6574_s1 + $0x950] sm:$0xf]  ;;  %v4393_v36 = vld [vmem:[%s6574_s1 + $0x970] sm:$0xf0]  ;;  %v3624_v59 = vld [vmem:[%s6574_s1 + $0x6c8] sm:$0xf] }
  0x4b   :  { %2273 = vmatpush.bf16.msra.mxu1 %v4017_v46  ;;  %v2797_v46 = vor.u32 %v4105_v38, %v2796_v34  ;;  %v2945_v34 = vor.u32 %v4137_v26, %v2942_v27  ;;  %v4128_v38 = vld [vmem:[%s6574_s1 + $0x12c] sm:$0xf]  ;;  %v2906_v39 = vld [vmem:[%s6574_s1 + $0x14c] sm:$0xf0]  ;;  %v4290_v15 = vld [vmem:[%s6574_s1 + $0x63c] sm:$0xf] }
  0x4c   :  { %2261 = vmatpush.bf16.msra.mxu0 %v3693_v49  ;;  %v3804_v49 = vld [vmem:[%s6574_s1 + $0x830] sm:$0xf]  ;;  %v4281_v26 = vld [vmem:[%s6574_s1 + $0x5f4] sm:$0xf] }
  0x4d   :  { %2284 = vmatpush.bf16.msra.mxu2 %v2941_v53  ;;  %v4096_v53 = vld [vmem:[%s6574_s1 + $0x28] sm:$0xf0] }
  0x4e   :  { %2297 = vmatpush.bf16.msra.mxu3 %v3229_v57  ;;  %v4057_v57 = vor.u32 %v4420_v45, %v4056_v44  ;;  %v3949_v44 = vor.u32 %v4393_v36, %v3948_v35  ;;  %v4240_v45 = vld [vmem:[%s6574_s1 + $0x4a8] sm:$0xf0]  ;;  %v3770_v36 = vld [vmem:[%s6574_s1 + $0x80c] sm:$0xf0] }
  0x4f   :  { %2274 = vmatpush.bf16.msra.mxu1 %v3981_v60  ;;  %v3805_v60 = vor.u32 %v4357_v51, %v3804_v49  ;;  %v4227_v49 = vld [vmem:[%s6574_s1 + $0x444] sm:$0xf]  ;;  %v3302_v51 = vld [vmem:[%s6574_s1 + $0x464] sm:$0xf0]  ;;  %v4344_v35 = vld [vmem:[%s6574_s1 + $0x7ec] sm:$0xf] }
  0x50   :  { %2262 = vmatpush.bf16.msra.mxu0 %v3657_v63  ;;  %v2761_v63 = vor.u32 %v4096_v53, %v2760_v48  ;;  %v2909_v48 = vor.u32 %v4128_v38, %v2906_v39  ;;  %v3661_v53 = vor.u32 %v4321_v42, %v3660_v41  ;;  %v3305_v62 = vor.u32 %v4227_v49, %v3302_v51  ;;  %v2762_v38 = vld [vmem:[%s6574_s1 + $0x2c] sm:$0xf0]  ;;  %v4272_v42 = vld [vmem:[%s6574_s1 + $0x5ac] sm:$0xf]  ;;  %v3734_v49 = vld [vmem:[%s6574_s1 + $0x7c4] sm:$0xf0] }
  0x51   :  { %2285 = vmatpush.bf16.msra.mxu2 %v2905_v2  ;;  %v4348_v2 = vld [vmem:[%s6574_s1 + $0x808] sm:$0xf0] }
  0x52   :  { %2298 = vmatpush.bf16.msra.mxu3 %v3193_v9  ;;  %v2132_v9 = vsel %vm2124_vm0, %v4057_v57, 0  ;;  %v2870_v57 = vld [vmem:[%s6574_s1 + $0x104] sm:$0xf0] }
  0x53   :  { %2275 = vmatpush.bf16.msra.mxu1 %v3945_v13  ;;  %v3769_v13 = vor.u32 %v4348_v2, %v3768_v1  ;;  %v2873_v2 = vor.u32 %v4119_v56, %v2870_v57  ;;  %v4263_v57 = vld [vmem:[%s6574_s1 + $0x564] sm:$0xf] }
  0x54   :  { %2263 = vmatpush.bf16.msra.mxu0 %v3621_v16  ;;  %v3445_v16 = vor.u32 %v4267_v7, %v3444_v6  ;;  %v3266_v6 = vld [vmem:[%s6574_s1 + $0x41c] sm:$0xf0]  ;;  %v4362_v7 = vld [vmem:[%s6574_s1 + $0x87c] sm:$0xf] }
  0x55   :  { %2286 = vmatpush.bf16.msra.mxu2 %v2869_v19  ;;  %v4021_v19 = vor.u32 %v4411_v12, %v4020_v11  ;;  %v4110_v11 = vld [vmem:[%s6574_s1 + $0x9c] sm:$0xf]  ;;  %v2834_v12 = vld [vmem:[%s6574_s1 + $0xbc] sm:$0xf0] }
  0x56   :  { %2299 = vmatpush.bf16.msra.mxu3 %v3157_v24  ;;  %v4402_v24 = vld [vmem:[%s6574_s1 + $0x9b8] sm:$0xf0]  ;;  %v2837_v18 = vor.u32 %v4110_v11, %v2834_v12  ;;  %v4173_v11 = vld [vmem:[%s6574_s1 + $0x294] sm:$0xf]  ;;  %v3086_v12 = vld [vmem:[%s6574_s1 + $0x2b4] sm:$0xf0] }
  0x57   :  { %2276 = vmatpush.bf16.msra.mxu1 %v3909_v28  ;;  %2264 = vmatmul.bf16.vlgmr.msra.gmra.mxu0 %v4718_v8 }
  0x58   :  { %2308 = vmatpush.bf16.msrb.mxu0 %v3589_v20  ;;  %v3408_v20 = vld [vmem:[%s6574_s1 + $0x518] sm:$0xf] }
  0x59   :  { %2287 = vmatpush.bf16.msra.mxu2 %v2833_v32  ;;  %v3409_v28 = vor.u32 %v4258_v21, %v3408_v20  ;;  %v3372_v32 = vld [vmem:[%s6574_s1 + $0x4d0] sm:$0xf]  ;;  %v3230_v20 = vld [vmem:[%s6574_s1 + $0x3d4] sm:$0xf0]  ;;  %v4353_v21 = vld [vmem:[%s6574_s1 + $0x834] sm:$0xf] }
  0x5a   :  { %2300 = vmatpush.bf16.msra.mxu3 %v3121_v37  ;;  %4083 = vmatmul.msk.bf16.vlgmr.msra.gmra.mxu1 %vm2120_vm1, %v4804_v50  ;;  %v3697_v37 = vor.u32 %v4330_v30, %v3696_v29  ;;  %v4416_v29 = vld [vmem:[%s6574_s1 + $0xa2c] sm:$0xf]  ;;  %v4058_v30 = vld [vmem:[%s6574_s1 + $0xa4c] sm:$0x30] }
  0x5b   :  { %2321 = vmatpush.bf16.msrb.mxu1 %v3877_v31  ;;  %v3985_v31 = vor.u32 %v4402_v24, %v3984_v23  ;;  %v4101_v23 = vld [vmem:[%s6574_s1 + $0x54] sm:$0xf]  ;;  %v2798_v24 = vld [vmem:[%s6574_s1 + $0x74] sm:$0xf0] }
  0x5c   :  { %2309 = vmatpush.bf16.msrb.mxu0 %v3553_v33  ;;  %v4249_v33 = vld [vmem:[%s6574_s1 + $0x4f0] sm:$0xf0] }
  0x5d   :  { %2288 = vmatpush.bf16.msra.mxu2 %v2797_v46  ;;  %v3373_v40 = vor.u32 %v4249_v33, %v3372_v32  ;;  %v3912_v46 = vld [vmem:[%s6574_s1 + $0x908] sm:$0xf]  ;;  %v2801_v32 = vor.u32 %v4101_v23, %v2798_v24  ;;  %v4200_v33 = vld [vmem:[%s6574_s1 + $0x36c] sm:$0xf]  ;;  %v3050_v23 = vld [vmem:[%s6574_s1 + $0x26c] sm:$0xf0] }
  0x5e   :  { %2301 = vmatpush.bf16.msra.mxu3 %v3085_v52  ;;  %v4371_v52 = vld [vmem:[%s6574_s1 + $0x8c4] sm:$0xf] }
  0x5f   :  { %2322 = vmatpush.bf16.msrb.mxu1 %v3841_v43  ;;  %v3336_v43 = vld [vmem:[%s6574_s1 + $0x488] sm:$0xf]  ;;  %v3881_v1 = vor.u32 %v4371_v52, %v3878_v55 }
  0x60   :  { %2310 = vmatpush.bf16.msrb.mxu0 %v3517_v47  ;;  %v4384_v47 = vld [vmem:[%s6574_s1 + $0x928] sm:$0xf0]  ;;  %v3337_v58 = vor.u32 %v4240_v45, %v3336_v43  ;;  %v3482_v43 = vld [vmem:[%s6574_s1 + $0x5cc] sm:$0xf0]  ;;  %v4022_v55 = vld [vmem:[%s6574_s1 + $0xa04] sm:$0xf0] }
  0x61   :  { %2289 = vmatpush.bf16.msra.mxu2 %v2761_v63  ;;  %v3913_v61 = vor.u32 %v4384_v47, %v3912_v46  ;;  %v4299_v63 = vld [vmem:[%s6574_s1 + $0x684] sm:$0xf]  ;;  %v3158_v47 = vld [vmem:[%s6574_s1 + $0x344] sm:$0xf0]  ;;  %v3485_v52 = vor.u32 %v4272_v42, %v3482_v43  ;;  %v4232_v43 = vld [vmem:[%s6574_s1 + $0x468] sm:$0xf0] }
  0x62   :  { %2302 = vmatpush.bf16.msra.mxu3 %v3049_v5  ;;  %v4218_v5 = vld [vmem:[%s6574_s1 + $0x3fc] sm:$0xf]  ;;  %v4191_v46 = vld [vmem:[%s6574_s1 + $0x324] sm:$0xf]  ;;  %v3308_v42 = vld [vmem:[%s6574_s1 + $0x448] sm:$0xf] }
  0x63   :  { %2323 = vmatpush.bf16.msrb.mxu1 %v3805_v60  ;;  %v4312_v60 = vld [vmem:[%s6574_s1 + $0x6e8] sm:$0xf0]  ;;  %v3269_v14 = vor.u32 %v4218_v5, %v3266_v6  ;;  %v3161_v56 = vor.u32 %v4191_v46, %v3158_v47  ;;  %v3986_v5 = vld [vmem:[%s6574_s1 + $0x9bc] sm:$0xf0]  ;;  %v4151_v47 = vld [vmem:[%s6574_s1 + $0x1e0] sm:$0xf0] }
  0x64   :  { %2311 = vmatpush.bf16.msrb.mxu0 %v3481_v0  ;;  %2290 = vmatmul.bf16.vlgmr.msra.gmra.mxu2 %v4684_v54  ;;  %v3590_v0 = vld [vmem:[%s6574_s1 + $0x6a4] sm:$0xf0]  ;;  %v2984_v46 = vld [vmem:[%s6574_s1 + $0x1c0] sm:$0xf] }
  0x65   :  { %2337 = vmatpush.bf16.msrb.mxu2 %v2132_v9  ;;  %2303 = vmatmul.bf16.vlgmr.msra.gmra.mxu3 %v4709_v4  ;;  %v3625_v9 = vor.u32 %v4312_v60, %v3624_v59  ;;  %v4182_v60 = vld [vmem:[%s6574_s1 + $0x2dc] sm:$0xf] }
  0x66   :  { %2347 = vmatpush.bf16.msrb.mxu3 %v3017_v10  ;;  %v3842_v10 = vld [vmem:[%s6574_s1 + $0x89c] sm:$0xf0] }
  0x67   :  { %2324 = vmatpush.bf16.msrb.mxu1 %v3769_v13  ;;  %v3593_v13 = vor.u32 %v4299_v63, %v3590_v0  ;;  %v3845_v17 = vor.u32 %v4362_v7, %v3842_v10  ;;  %v4326_v63 = vld [vmem:[%s6574_s1 + $0x75c] sm:$0xf]  ;;  %v3698_v0 = vld [vmem:[%s6574_s1 + $0x77c] sm:$0xf0] }
  0x68   :  { %2312 = vmatpush.bf16.msrb.mxu0 %v3445_v16  ;;  %v3554_v16 = vld [vmem:[%s6574_s1 + $0x65c] sm:$0xf0]  ;;  %v4254_v7 = vld [vmem:[%s6574_s1 + $0x51c] sm:$0xf]  ;;  %v3701_v10 = vor.u32 %v4326_v63, %v3698_v0  ;;  %v3524_v0 = vld [vmem:[%s6574_s1 + $0x5f8] sm:$0xf] }
  0x69   :  { %2338 = vmatpush.bf16.msrb.mxu2 %v4021_v19  ;;  %v4209_v19 = vld [vmem:[%s6574_s1 + $0x3b4] sm:$0xf] }
  0x6a   :  { %2348 = vmatpush.bf16.msrb.mxu3 %v2981_v22  ;;  %v3806_v22 = vld [vmem:[%s6574_s1 + $0x854] sm:$0xf0]  ;;  %v3233_v27 = vor.u32 %v4209_v19, %v3230_v20  ;;  %v4245_v19 = vld [vmem:[%s6574_s1 + $0x4d4] sm:$0xf]  ;;  %v3089_v20 = vor.u32 %v4173_v11, %v3086_v12  ;;  %v2912_v12 = vld [vmem:[%s6574_s1 + $0x130] sm:$0xf] }
  0x6b   :  { %2325 = vmatpush.bf16.msrb.mxu1 %v3733_v25  ;;  %v3557_v25 = vor.u32 %v4290_v15, %v3554_v16  ;;  %v3662_v15 = vld [vmem:[%s6574_s1 + $0x734] sm:$0xf0] }
  0x6c   :  { %2313 = vmatpush.bf16.msrb.mxu0 %v3409_v28  ;;  %v3518_v28 = vld [vmem:[%s6574_s1 + $0x614] sm:$0xf0] }
  0x6d   :  { %2339 = vmatpush.bf16.msrb.mxu2 %v3985_v31  ;;  %v3809_v31 = vor.u32 %v4353_v21, %v3806_v22  ;;  %v3521_v39 = vor.u32 %v4281_v26, %v3518_v28  ;;  %v3374_v21 = vld [vmem:[%s6574_s1 + $0x4f4] sm:$0xf0]  ;;  %v4164_v22 = vld [vmem:[%s6574_s1 + $0x24c] sm:$0xf]  ;;  %v3626_v26 = vld [vmem:[%s6574_s1 + $0x6ec] sm:$0xf0] }
  0x6e   :  { %2349 = vmatpush.bf16.msrb.mxu3 %v2945_v34  ;;  %v3194_v34 = vld [vmem:[%s6574_s1 + $0x38c] sm:$0xf0] }
  0x6f   :  { %2326 = vmatpush.bf16.msrb.mxu1 %v3697_v37  ;;  %v4092_v37 = vld [vmem:[%s6574_s1 + $0xc] sm:$0xf]  ;;  %v3197_v41 = vor.u32 %v4200_v33, %v3194_v34  ;;  %v3914_v34 = vld [vmem:[%s6574_s1 + $0x92c] sm:$0xf0] }
  0x70   :  { %2314 = vmatpush.bf16.msrb.mxu0 %v3373_v40  ;;  %v4061_v40 = vor.u32 %v4416_v29, %v4058_v30  ;;  %v2765_v45 = vor.u32 %v4092_v37, %v2762_v38  ;;  %v4160_v29 = vld [vmem:[%s6574_s1 + $0x228] sm:$0xf0]  ;;  %v3596_v30 = vld [vmem:[%s6574_s1 + $0x688] sm:$0xf]  ;;  %v3338_v37 = vld [vmem:[%s6574_s1 + $0x4ac] sm:$0xf0] }
  0x71   :  { %2340 = vmatpush.bf16.msrb.mxu2 %v3949_v44  ;;  %v3773_v44 = vor.u32 %v4344_v35, %v3770_v36  ;;  %v4380_v33 = vld [vmem:[%s6574_s1 + $0x90c] sm:$0xf]  ;;  %v3053_v36 = vor.u32 %v4164_v22, %v3050_v23  ;;  %v3884_v38 = vld [vmem:[%s6574_s1 + $0x8c8] sm:$0xf]  ;;  %v4205_v22 = vld [vmem:[%s6574_s1 + $0x390] sm:$0xf0] }
  0x72   :  { %2350 = vmatpush.bf16.msrb.mxu3 %v2909_v48  ;;  %v4335_v48 = vld [vmem:[%s6574_s1 + $0x7a4] sm:$0xf]  ;;  %v2135_v51 = vsel %vm2124_vm0, %v4061_v40, 0  ;;  %v4236_v35 = vld [vmem:[%s6574_s1 + $0x48c] sm:$0xf] }
  0x73   :  { %2327 = vmatpush.bf16.msrb.mxu1 %v3661_v53  ;;  %v4407_v53 = vld [vmem:[%s6574_s1 + $0x9e4] sm:$0xf]  ;;  %v3737_v59 = vor.u32 %v4335_v48, %v3734_v49  ;;  %v3341_v48 = vor.u32 %v4236_v35, %v3338_v37 }
  0x74   :  { %2315 = vmatpush.bf16.msrb.mxu0 %v3337_v58  ;;  %v3446_v58 = vld [vmem:[%s6574_s1 + $0x584] sm:$0xf0]  ;;  %v4115_v37 = vld [vmem:[%s6574_s1 + $0xc0] sm:$0xf0] }
  0x75   :  { %2341 = vmatpush.bf16.msrb.mxu2 %v3913_v61  ;;  %v3122_v61 = vld [vmem:[%s6574_s1 + $0x2fc] sm:$0xf0] }
  0x76   :  { %2351 = vmatpush.bf16.msrb.mxu3 %v2873_v2  ;;  %v4398_v2 = vld [vmem:[%s6574_s1 + $0x99c] sm:$0xf]  ;;  %v3125_v6 = vor.u32 %v4182_v60, %v3122_v61  ;;  %v2948_v61 = vld [vmem:[%s6574_s1 + $0x178] sm:$0xf] }
  0x77   :  { %2328 = vmatpush.bf16.msrb.mxu1 %v3625_v9  ;;  %2316 = vmatmul.bf16.vlgmr.msrb.gmra.mxu0 %v4707_v3  ;;  %v3410_v9 = vld [vmem:[%s6574_s1 + $0x53c] sm:$0xf0] }
  0x78   :  { %2360 = vmatpush.bf16.msra.mxu0 %v3305_v62  ;;  %4084 = vmatmul.msk.bf16.vlgmr.msrb.gmra.mxu2 %vm2120_vm1, %v4804_v50  ;;  %v4025_v62 = vor.u32 %v4407_v53, %v4022_v55  ;;  %v3413_v16 = vor.u32 %v4254_v7, %v3410_v9  ;;  %v3309_v53 = vor.u32 %v4232_v43, %v3308_v42  ;;  %v3848_v55 = vld [vmem:[%s6574_s1 + $0x880] sm:$0xf]  ;;  %v3236_v9 = vld [vmem:[%s6574_s1 + $0x3b8] sm:$0xf]  ;;  %v4331_v43 = vld [vmem:[%s6574_s1 + $0x780] sm:$0xf0] }
  0x79   :  { %2386 = vmatpush.bf16.msra.mxu2 %v3881_v1  ;;  %v3449_v1 = vor.u32 %v4263_v57, %v3446_v58  ;;  %v2985_v57 = vor.u32 %v4151_v47, %v2984_v46  ;;  %v3272_v58 = vld [vmem:[%s6574_s1 + $0x400] sm:$0xf]  ;;  %v4187_v46 = vld [vmem:[%s6574_s1 + $0x300] sm:$0xf0] }
  0x7a   :  { %2352 = vmatpush.bf16.msrb.mxu3 %v2837_v18  ;;  %2329 = vmatmul.bf16.vlgmr.msrb.gmra.mxu1 %v4718_v8  ;;  %v3950_v18 = vld [vmem:[%s6574_s1 + $0x974] sm:$0xf0]  ;;  %v3704_v42 = vld [vmem:[%s6574_s1 + $0x760] sm:$0xf] }
  0x7b   :  { %2373 = vmatpush.bf16.msra.mxu1 %v3593_v13  ;;  %v3989_v13 = vor.u32 %v4398_v2, %v3986_v5  ;;  %v3812_v5 = vld [vmem:[%s6574_s1 + $0x838] sm:$0xf] }
  0x7c   :  { %2361 = vmatpush.bf16.msra.mxu0 %v3269_v14  ;;  %v4317_v14 = vld [vmem:[%s6574_s1 + $0x714] sm:$0xf] }
  0x7d   :  { %2387 = vmatpush.bf16.msra.mxu2 %v3845_v17  ;;  %v4389_v17 = vld [vmem:[%s6574_s1 + $0x954] sm:$0xf]  ;;  %v3665_v24 = vor.u32 %v4317_v14, %v3662_v15  ;;  %v3488_v15 = vld [vmem:[%s6574_s1 + $0x5b0] sm:$0xf] }
  0x7e   :  { %2353 = vmatpush.bf16.msrb.mxu3 %v2801_v32  ;;  %v3953_v28 = vor.u32 %v4389_v17, %v3950_v18  ;;  %v3377_v32 = vor.u32 %v4245_v19, %v3374_v21  ;;  %v3776_v18 = vld [vmem:[%s6574_s1 + $0x7f0] sm:$0xf]  ;;  %v4349_v19 = vld [vmem:[%s6574_s1 + $0x810] sm:$0xf0] }
  0x7f   :  { %2374 = vmatpush.bf16.msra.mxu1 %v3557_v25  ;;  %v4308_v25 = vld [vmem:[%s6574_s1 + $0x6cc] sm:$0xf]  ;;  %v3200_v21 = vld [vmem:[%s6574_s1 + $0x370] sm:$0xf] }
  0x80   :  { %2362 = vmatpush.bf16.msra.mxu0 %v3233_v27  ;;  %v3020_v27 = vld [vmem:[%s6574_s1 + $0x208] sm:$0xf]  ;;  %v3629_v40 = vor.u32 %v4308_v25, %v3626_v26  ;;  %v4124_v25 = vld [vmem:[%s6574_s1 + $0x108] sm:$0xf0]  ;;  %v3777_v26 = vor.u32 %v4349_v19, %v3776_v18  ;;  %v4169_v19 = vld [vmem:[%s6574_s1 + $0x270] sm:$0xf0] }
  0x81   :  { %2388 = vmatpush.bf16.msra.mxu2 %v3809_v31  ;;  %v4304_v31 = vld [vmem:[%s6574_s1 + $0x6a8] sm:$0xf0] }
  0x82   :  { %2354 = vmatpush.bf16.msrb.mxu3 %v2765_v45  ;;  %v3917_v45 = vor.u32 %v4380_v33, %v3914_v34  ;;  %v3164_v33 = vld [vmem:[%s6574_s1 + $0x328] sm:$0xf]  ;;  %v4196_v34 = vld [vmem:[%s6574_s1 + $0x348] sm:$0xf0] }
  0x83   :  { %2375 = vmatpush.bf16.msra.mxu1 %v3521_v39  ;;  %v4376_v39 = vld [vmem:[%s6574_s1 + $0x8e8] sm:$0xf0] }
  0x84   :  { %2363 = vmatpush.bf16.msra.mxu0 %v3197_v41  ;;  %v3021_v41 = vor.u32 %v4160_v29, %v3020_v27  ;;  %v3885_v49 = vor.u32 %v4376_v39, %v3884_v38  ;;  %v3452_v27 = vld [vmem:[%s6574_s1 + $0x568] sm:$0xf]  ;;  %v3201_v29 = vor.u32 %v4205_v22, %v3200_v21  ;;  %v3416_v39 = vld [vmem:[%s6574_s1 + $0x520] sm:$0xf]  ;;  %v3598_v21 = vld [vmem:[%s6574_s1 + $0x6ac] sm:$0xf0] }
  0x85   :  { %2389 = vmatpush.bf16.msra.mxu2 %v3773_v44  ;;  %2355 = vmatmul.bf16.vlgmr.msrb.gmra.mxu3 %v4684_v54  ;;  %v3597_v44 = vor.u32 %v4304_v31, %v3596_v30  ;;  %v3740_v30 = vld [vmem:[%s6574_s1 + $0x7a8] sm:$0xf]  ;;  %v4340_v31 = vld [vmem:[%s6574_s1 + $0x7c8] sm:$0xf0] }
  0x86   :  { %2402 = vmatpush.bf16.msra.mxu3 %v2135_v51  ;;  %v3560_v51 = vld [vmem:[%s6574_s1 + $0x640] sm:$0xf]  ;;  %v3741_v38 = vor.u32 %v4340_v31, %v3740_v30  ;;  %v4412_v30 = vld [vmem:[%s6574_s1 + $0xa08] sm:$0xf0] }
  0x87   :  { %2376 = vmatpush.bf16.msra.mxu1 %v3485_v52  ;;  %v4295_v52 = vld [vmem:[%s6574_s1 + $0x660] sm:$0xf0] }
  0x88   :  { %2364 = vmatpush.bf16.msra.mxu0 %v3161_v56  ;;  %v4367_v56 = vld [vmem:[%s6574_s1 + $0x8a0] sm:$0xf0]  ;;  %v3561_v60 = vor.u32 %v4295_v52, %v3560_v51  ;;  %v3380_v51 = vld [vmem:[%s6574_s1 + $0x4d8] sm:$0xf]  ;;  %v3705_v52 = vor.u32 %v4331_v43, %v3704_v42 }
  0x89   :  { %2390 = vmatpush.bf16.msra.mxu2 %v3737_v59  ;;  %v4223_v59 = vld [vmem:[%s6574_s1 + $0x420] sm:$0xf0]  ;;  %v3849_v63 = vor.u32 %v4367_v56, %v3848_v55  ;;  %v3668_v55 = vld [vmem:[%s6574_s1 + $0x718] sm:$0xf] }
  0x8a   :  { %2403 = vmatpush.bf16.msra.mxu3 %v4025_v62  ;;  %v4142_v62 = vld [vmem:[%s6574_s1 + $0x198] sm:$0xf0]  ;;  %v3273_v2 = vor.u32 %v4223_v59, %v3272_v58  ;;  %v5543_v56 = vld [vmem:[%s6576_s2] sm:$0xff]  ;;  %v4064_v59 = vld [vmem:[%s6574_s1 + $0xa30] sm:$0xf] }
  0x8b   :  { %2377 = vmatpush.bf16.msra.mxu1 %v3449_v1  ;;  %v4286_v1 = vld [vmem:[%s6574_s1 + $0x618] sm:$0xf0]  ;;  %v2949_v7 = vor.u32 %v4142_v62, %v2948_v61  ;;  %v3092_v62 = vld [vmem:[%s6574_s1 + $0x298] sm:$0xf] }
  0x8c   :  { %2365 = vmatpush.bf16.msra.mxu0 %v3125_v6  ;;  %v4358_v6 = vld [vmem:[%s6574_s1 + $0x858] sm:$0xf0]  ;;  %v3525_v11 = vor.u32 %v4286_v1, %v3524_v0  ;;  %v2768_v0 = vld [vmem:[%s6574_s1 + $0x10] sm:$0xf] }
  0x8d   :  { %2391 = vmatpush.bf16.msra.mxu2 %v3701_v10  ;;  %v4214_v10 = vld [vmem:[%s6574_s1 + $0x3d8] sm:$0xf0]  ;;  %v3813_v14 = vor.u32 %v4358_v6, %v3812_v5  ;;  %v3344_v5 = vld [vmem:[%s6574_s1 + $0x490] sm:$0xf]  ;;  %v392_v6 = vperm.slane %v5543_v56, 0 }
  0x8e   :  { %2404 = vmatpush.bf16.msra.mxu3 %v3989_v13  ;;  %v4133_v13 = vld [vmem:[%s6574_s1 + $0x150] sm:$0xf0]  ;;  %v3237_v17 = vor.u32 %v4214_v10, %v3236_v9  ;;  %v4322_v58 = vld [vmem:[%s6574_s1 + $0x738] sm:$0xf0] }
  0x8f   :  { %2378 = vmatpush.bf16.msra.mxu1 %v3413_v16  ;;  %v4277_v16 = vld [vmem:[%s6574_s1 + $0x5d0] sm:$0xf0] }
  0x90   :  { %2366 = vmatpush.bf16.msra.mxu0 %v3089_v20  ;;  %v2913_v20 = vor.u32 %v4133_v13, %v2912_v12  ;;  %v3489_v23 = vor.u32 %v4277_v16, %v3488_v15  ;;  %v4241_v9 = vld [vmem:[%s6574_s1 + $0x4b0] sm:$0xf0]  ;;  %v3310_v12 = vld [vmem:[%s6574_s1 + $0x46c] sm:$0xf0] }
  0x91   :  { %2392 = vmatpush.bf16.msra.mxu2 %v3665_v24  ;;  %v2876_v24 = vld [vmem:[%s6574_s1 + $0xe8] sm:$0xf]  ;;  %v4313_v15 = vld [vmem:[%s6574_s1 + $0x6f0] sm:$0xf0]  ;;  %v3056_v16 = vld [vmem:[%s6574_s1 + $0x250] sm:$0xf]  ;;  %v3345_v22 = vor.u32 %v4241_v9, %v3344_v5 }
  0x92   :  { %2405 = vmatpush.bf16.msra.mxu3 %v3953_v28  ;;  %v4268_v28 = vld [vmem:[%s6574_s1 + $0x588] sm:$0xf0]  ;;  %v3057_v31 = vor.u32 %v4169_v19, %v3056_v16  ;;  %v3202_v5 = vld [vmem:[%s6574_s1 + $0x394] sm:$0xf0]  ;;  %v4273_v9 = vld [vmem:[%s6574_s1 + $0x5b4] sm:$0xf] }
  0x93   :  { %2379 = vmatpush.bf16.msra.mxu1 %v3377_v32  ;;  %v2877_v32 = vor.u32 %v4124_v25, %v2876_v24  ;;  %v3453_v35 = vor.u32 %v4268_v28, %v3452_v27  ;;  %v4156_v24 = vld [vmem:[%s6574_s1 + $0x20c] sm:$0xf]  ;;  %v3022_v25 = vld [vmem:[%s6574_s1 + $0x22c] sm:$0xf0] }
  0x94   :  { %2367 = vmatpush.bf16.msra.mxu0 %v3053_v36  ;;  %v2840_v36 = vld [vmem:[%s6574_s1 + $0xa0] sm:$0xf]  ;;  %v3920_v16 = vld [vmem:[%s6574_s1 + $0x910] sm:$0xf] }
  0x95   :  { %2393 = vmatpush.bf16.msra.mxu2 %v3629_v40  ;;  %v4259_v40 = vld [vmem:[%s6574_s1 + $0x540] sm:$0xf0] }
  0x96   :  { %2406 = vmatpush.bf16.msra.mxu3 %v3917_v45  ;;  %v3128_v45 = vld [vmem:[%s6574_s1 + $0x2e0] sm:$0xf]  ;;  %v3417_v47 = vor.u32 %v4259_v40, %v3416_v39  ;;  %v4147_v40 = vld [vmem:[%s6574_s1 + $0x1c4] sm:$0xf] }
  0x97   :  { %2380 = vmatpush.bf16.msra.mxu1 %v3341_v48  ;;  %2368 = vmatmul.bf16.vlgmr.msra.gmra.mxu0 %v4709_v4  ;;  %v2804_v48 = vld [vmem:[%s6574_s1 + $0x58] sm:$0xf] }
  0x98   :  { %2412 = vmatpush.bf16.msrb.mxu0 %v3021_v41  ;;  %2394 = vmatmul.bf16.vlgmr.msra.gmra.mxu2 %v4718_v8  ;;  %v3165_v41 = vor.u32 %v4196_v34, %v3164_v33  ;;  %v4219_v33 = vld [vmem:[%s6574_s1 + $0x404] sm:$0xf]  ;;  %v3274_v34 = vld [vmem:[%s6574_s1 + $0x424] sm:$0xf0] }
  0x99   :  { %2438 = vmatpush.bf16.msrb.mxu2 %v3597_v44  ;;  %4085 = vmatmul.msk.bf16.vlgmr.msra.gmra.mxu3 %vm2120_vm1, %v4804_v50  ;;  %v2841_v44 = vor.u32 %v4115_v37, %v2840_v36  ;;  %v3025_v36 = vor.u32 %v4156_v24, %v3022_v25  ;;  %v4291_v37 = vld [vmem:[%s6574_s1 + $0x644] sm:$0xf]  ;;  %v3277_v43 = vor.u32 %v4219_v33, %v3274_v34 }
  0x9a   :  { %2451 = vmatpush.bf16.msrb.mxu3 %v3885_v49  ;;  %2381 = vmatmul.bf16.vlgmr.msra.gmra.mxu1 %v4707_v3  ;;  %v4106_v49 = vld [vmem:[%s6574_s1 + $0x78] sm:$0xf0] }
  0x9b   :  { %2425 = vmatpush.bf16.msrb.mxu1 %v3309_v53  ;;  %v4250_v53 = vld [vmem:[%s6574_s1 + $0x4f8] sm:$0xf0]  ;;  %v2805_v61 = vor.u32 %v4106_v49, %v2804_v48  ;;  %v3238_v48 = vld [vmem:[%s6574_s1 + $0x3dc] sm:$0xf0] }
  0x9c   :  { %2413 = vmatpush.bf16.msrb.mxu0 %v2985_v57  ;;  %v3129_v57 = vor.u32 %v4187_v46, %v3128_v45  ;;  %v3381_v1 = vor.u32 %v4250_v53, %v3380_v51  ;;  %v4403_v45 = vld [vmem:[%s6574_s1 + $0x9c0] sm:$0xf0]  ;;  %v4282_v53 = vld [vmem:[%s6574_s1 + $0x5fc] sm:$0xf] }
  0x9d   :  { %2439 = vmatpush.bf16.msrb.mxu2 %v3561_v60  ;;  %v4421_v60 = vld [vmem:[%s6574_s1 + $0xa50] sm:$0x30] }
  0x9e   :  { %2452 = vmatpush.bf16.msrb.mxu3 %v3849_v63  ;;  %v4178_v63 = vld [vmem:[%s6574_s1 + $0x2b8] sm:$0xf0]  ;;  %v4065_v10 = vor.u32 %v4421_v60, %v4064_v59  ;;  %v2950_v60 = vld [vmem:[%s6574_s1 + $0x19c] sm:$0xf0] }
  0x9f   :  { %2426 = vmatpush.bf16.msrb.mxu1 %v3273_v2  ;;  %v4097_v2 = vld [vmem:[%s6574_s1 + $0x30] sm:$0xf0]  ;;  %v3093_v13 = vor.u32 %v4178_v63, %v3092_v62  ;;  %v4138_v59 = vld [vmem:[%s6574_s1 + $0x17c] sm:$0xf]  ;;  %v3956_v63 = vld [vmem:[%s6574_s1 + $0x958] sm:$0xf] }
  0xa0   :  { %2414 = vmatpush.bf16.msrb.mxu0 %v2949_v7  ;;  %v3669_v7 = vor.u32 %v4322_v58, %v3668_v55  ;;  %v2161_v18 = vpop.f32.mrf.mxu0  ;;  %v3526_v55 = vld [vmem:[%s6574_s1 + $0x61c] sm:$0xf0] }
  0xa1   :  { %2440 = vmatpush.bf16.msrb.mxu2 %v3525_v11  ;;  %v4228_v11 = vld [vmem:[%s6574_s1 + $0x44c] sm:$0xf] }
  0xa2   :  { %2453 = vmatpush.bf16.msrb.mxu3 %v3813_v14  ;;  %v3632_v14 = vld [vmem:[%s6574_s1 + $0x6d0] sm:$0xf]  ;;  %v3313_v27 = vor.u32 %v4228_v11, %v3310_v12 }
  0xa3   :  { %2427 = vmatpush.bf16.msrb.mxu1 %v3237_v17  ;;  %v2769_v17 = vor.u32 %v4097_v2, %v2768_v0  ;;  %v3633_v28 = vor.u32 %v4313_v15, %v3632_v14  ;;  %v4394_v0 = vld [vmem:[%s6574_s1 + $0x978] sm:$0xf0]  ;;  %v4201_v2 = vld [vmem:[%s6574_s1 + $0x374] sm:$0xf]  ;;  %v2914_v14 = vld [vmem:[%s6574_s1 + $0x154] sm:$0xf0] }
  0xa4   :  { %2415 = vmatpush.bf16.msrb.mxu0 %v2913_v20  ;;  %v4300_v20 = vld [vmem:[%s6574_s1 + $0x68c] sm:$0xf]  ;;  %v3957_v11 = vor.u32 %v4394_v0, %v3956_v63  ;;  %v3205_v15 = vor.u32 %v4201_v2, %v3202_v5  ;;  %v3778_v2 = vld [vmem:[%s6574_s1 + $0x814] sm:$0xf0]  ;;  %v3028_v5 = vld [vmem:[%s6574_s1 + $0x210] sm:$0xf] }
  0xa5   :  { %2441 = vmatpush.bf16.msrb.mxu2 %v3489_v23  ;;  %v2162_v23 = vadd.f32 %v2161_v18, %v392_v6  ;;  %v4192_v18 = vld [vmem:[%s6574_s1 + $0x32c] sm:$0xf] }
  0xa6   :  { %2454 = vmatpush.bf16.msrb.mxu3 %v3777_v26  ;;  %v2138_v26 = vsel %vm2124_vm0, %v4065_v10, 0  ;;  %v3490_v10 = vld [vmem:[%s6574_s1 + $0x5d4] sm:$0xf0] }
  0xa7   :  { %2428 = vmatpush.bf16.msrb.mxu1 %v3201_v29  ;;  %v4028_v29 = vld [vmem:[%s6574_s1 + $0x9e8] sm:$0xf]  ;;  %v2187_v49 = vpop.f32.mrf.mxu2  ;;  %v3493_v19 = vor.u32 %v4273_v9, %v3490_v10  ;;  %v4417_v9 = vld [vmem:[%s6574_s1 + $0xa34] sm:$0xf]  ;;  %v4066_v10 = vld [vmem:[%s6574_s1 + $0xa54] sm:$0x30] }
  0xa8   :  { %2416 = vmatpush.bf16.msrb.mxu0 %v2877_v32  ;;  %v3601_v32 = vor.u32 %v4300_v20, %v3598_v21  ;;  %v4029_v39 = vor.u32 %v4412_v30, %v4028_v29  ;;  %v3166_v20 = vld [vmem:[%s6574_s1 + $0x34c] sm:$0xf0]  ;;  %v4372_v21 = vld [vmem:[%s6574_s1 + $0x8cc] sm:$0xf] }
  0xa9   :  { %2442 = vmatpush.bf16.msrb.mxu2 %v3453_v35  ;;  %v2174_v35 = vpop.f32.mrf.mxu1  ;;  %v3169_v33 = vor.u32 %v4192_v18, %v3166_v20  ;;  %v4069_v20 = vor.u32 %v4417_v9, %v4066_v10  ;;  %v4309_v10 = vld [vmem:[%s6574_s1 + $0x6d4] sm:$0xf] }
  0xaa   :  { %2455 = vmatpush.bf16.msrb.mxu3 %v3741_v38  ;;  %v3562_v38 = vld [vmem:[%s6574_s1 + $0x664] sm:$0xf0]  ;;  %v2175_v42 = vadd.f32 %v2174_v35, %v2162_v23  ;;  %v4183_v35 = vld [vmem:[%s6574_s1 + $0x2e4] sm:$0xf] }
  0xab   :  { %2429 = vmatpush.bf16.msrb.mxu1 %v3165_v41  ;;  %v2986_v41 = vld [vmem:[%s6574_s1 + $0x1e4] sm:$0xf0]  ;;  %v3565_v46 = vor.u32 %v4291_v37, %v3562_v38  ;;  %v4363_v38 = vld [vmem:[%s6574_s1 + $0x884] sm:$0xf] }
  0xac   :  { %2417 = vmatpush.bf16.msrb.mxu0 %v2841_v44  ;;  %v3992_v44 = vld [vmem:[%s6574_s1 + $0x9a0] sm:$0xf]  ;;  %v2989_v51 = vor.u32 %v4147_v40, %v2986_v41  ;;  %v3130_v37 = vld [vmem:[%s6574_s1 + $0x304] sm:$0xf0]  ;;  %v4255_v41 = vld [vmem:[%s6574_s1 + $0x524] sm:$0xf] }
  0xad   :  { %2443 = vmatpush.bf16.msrb.mxu2 %v3417_v47  ;;  %v4210_v47 = vld [vmem:[%s6574_s1 + $0x3bc] sm:$0xf]  ;;  %v3993_v58 = vor.u32 %v4403_v45, %v3992_v44  ;;  %v2842_v44 = vld [vmem:[%s6574_s1 + $0xc4] sm:$0xf0]  ;;  %v3133_v45 = vor.u32 %v4183_v35, %v3130_v37  ;;  %v4408_v35 = vld [vmem:[%s6574_s1 + $0x9ec] sm:$0xf] }
  0xae   :  { %2456 = vmatpush.bf16.msrb.mxu3 %v3705_v52  ;;  %v2163_v52 = vpop.f32.mrf.mxu0  ;;  %v3241_v62 = vor.u32 %v4210_v47, %v3238_v48  ;;  %v4174_v47 = vld [vmem:[%s6574_s1 + $0x29c] sm:$0xf] }
  0xaf   :  { %2430 = vmatpush.bf16.msrb.mxu1 %v3129_v57  ;;  %v2200_v57 = vpop.f32.mrf.mxu3  ;;  %v2189_v23 = vpop.f32.mrf.mxu2  ;;  %v3814_v52 = vld [vmem:[%s6574_s1 + $0x85c] sm:$0xf0] }
  0xb0   :  { %2418 = vmatpush.bf16.msrb.mxu0 %v2805_v61  ;;  %v2188_v61 = vadd.f32 %v2187_v49, %v2175_v42  ;;  %v3418_v42 = vld [vmem:[%s6574_s1 + $0x544] sm:$0xf0]  ;;  %v3094_v49 = vld [vmem:[%s6574_s1 + $0x2bc] sm:$0xf0] }
  0xb1   :  { %2444 = vmatpush.bf16.msrb.mxu2 %v3381_v1  ;;  %v3529_v1 = vor.u32 %v4282_v53, %v3526_v55  ;;  %v2176_v6 = vpop.f32.mrf.mxu1  ;;  %v3421_v48 = vor.u32 %v4255_v41, %v3418_v42  ;;  %v4246_v55 = vld [vmem:[%s6574_s1 + $0x4dc] sm:$0xf]  ;;  %v3097_v63 = vor.u32 %v4174_v47, %v3094_v49  ;;  %v3244_v47 = vld [vmem:[%s6574_s1 + $0x3c0] sm:$0xf] }
  0xb2   :  { %2457 = vmatpush.bf16.msrb.mxu3 %v3669_v7  ;;  %v2953_v7 = vor.u32 %v4138_v59, %v2950_v60  ;;  %v2201_v12 = vadd.f32 %v2200_v57, %v2188_v61  ;;  %v3382_v57 = vld [vmem:[%s6574_s1 + $0x4fc] sm:$0xf0]  ;;  %v4165_v61 = vld [vmem:[%s6574_s1 + $0x254] sm:$0xf] }
  0xb3   :  { %2431 = vmatpush.bf16.msrb.mxu1 %v3093_v13  ;;  %v4129_v13 = vld [vmem:[%s6574_s1 + $0x134] sm:$0xf]  ;;  %v2806_v60 = vld [vmem:[%s6574_s1 + $0x7c] sm:$0xf0]  ;;  %v3385_v6 = vor.u32 %v4246_v55, %v3382_v57  ;;  %v4318_v57 = vld [vmem:[%s6574_s1 + $0x71c] sm:$0xf] }
  0xb4   :  { %2419 = vmatpush.bf16.msrb.mxu0 %v2769_v17  ;;  %v4385_v17 = vld [vmem:[%s6574_s1 + $0x930] sm:$0xf0]  ;;  %v2917_v24 = vor.u32 %v4129_v13, %v2914_v14  ;;  %v3346_v13 = vld [vmem:[%s6574_s1 + $0x4b4] sm:$0xf0] }
  0xb5   :  { %2445 = vmatpush.bf16.msrb.mxu2 %v3345_v22  ;;  %v3886_v22 = vld [vmem:[%s6574_s1 + $0x8ec] sm:$0xf0]  ;;  %v3921_v29 = vor.u32 %v4385_v17, %v3920_v16  ;;  %v4093_v14 = vld [vmem:[%s6574_s1 + $0x14] sm:$0xf] }
  0xb6   :  { %2458 = vmatpush.bf16.msrb.mxu3 %v3633_v28  ;;  %v2213_v25 = vpop.f32.mrf.mxu0  ;;  %v3889_v34 = vor.u32 %v4372_v21, %v3886_v22  ;;  %v3316_v16 = vld [vmem:[%s6574_s1 + $0x450] sm:$0xf]  ;;  %v4233_v17 = vld [vmem:[%s6574_s1 + $0x470] sm:$0xf0]  ;;  %v393_v21 = vperm.slane %v5543_v56, 1 }
  0xb7   :  { %2432 = vmatpush.bf16.msrb.mxu1 %v3057_v31  ;;  %2420 = vmatmul.bf16.vlgmr.msrb.gmra.mxu0 %v4684_v54  ;;  %v2202_v28 = vpop.f32.mrf.mxu3  ;;  %v2214_v30 = vadd.f32 %v2213_v25, %v2201_v12  ;;  %v4120_v31 = vld [vmem:[%s6574_s1 + $0xec] sm:$0xf]  ;;  %v4237_v12 = vld [vmem:[%s6574_s1 + $0x494] sm:$0xf]  ;;  %v3742_v25 = vld [vmem:[%s6574_s1 + $0x7cc] sm:$0xf0] }
  0xb8   :  { %2467 = vmatpush.bf16.msra.mxu0 %v2138_v26  ;;  %2446 = vmatmul.bf16.vlgmr.msrb.gmra.mxu2 %v4707_v3  ;;  %v4264_v26 = vld [vmem:[%s6574_s1 + $0x56c] sm:$0xf]  ;;  %v3349_v23 = vor.u32 %v4237_v12, %v3346_v13  ;;  %v3317_v28 = vor.u32 %v4233_v17, %v3316_v16  ;;  %v2884_v12 = vld [vmem:[%s6574_s1 + $0xf0] sm:$0xf]  ;;  %v4305_v17 = vld [vmem:[%s6574_s1 + $0x6b0] sm:$0xf0] }
  0xb9   :  { %2490 = vmatpush.bf16.msra.mxu2 %v3313_v27  ;;  %2459 = vmatmul.bf16.vlgmr.msrb.gmra.mxu3 %v4718_v8  ;;  %v3454_v27 = vld [vmem:[%s6574_s1 + $0x58c] sm:$0xf0]  ;;  %2737 = vst [vmem:[%s6577_s3] sm:$0xff] %v2214_v30  ;;  %v4152_v30 = vld [vmem:[%s6574_s1 + $0x1e8] sm:$0xf0] }
  0xba   :  { %2503 = vmatpush.bf16.msra.mxu3 %v3601_v32  ;;  %2433 = vmatmul.bf16.vlgmr.msrb.gmra.mxu1 %v4709_v4  ;;  %v2878_v32 = vld [vmem:[%s6574_s1 + $0x10c] sm:$0xf0] }
  0xbb   :  { %2477 = vmatpush.bf16.msra.mxu1 %v3025_v36  ;;  %v3457_v36 = vor.u32 %v4264_v26, %v3454_v27  ;;  %v2881_v40 = vor.u32 %v4120_v31, %v2878_v32  ;;  %v3280_v31 = vld [vmem:[%s6574_s1 + $0x408] sm:$0xf]  ;;  %v4224_v32 = vld [vmem:[%s6574_s1 + $0x428] sm:$0xf0]  ;;  %v3604_v16 = vld [vmem:[%s6574_s1 + $0x690] sm:$0xf] }
  0xbc   :  { %2468 = vmatpush.bf16.msra.mxu0 %v4029_v39  ;;  %v3850_v39 = vld [vmem:[%s6574_s1 + $0x8a4] sm:$0xf0]  ;;  %v3281_v42 = vor.u32 %v4224_v32, %v3280_v31  ;;  %v4377_v31 = vld [vmem:[%s6574_s1 + $0x8f0] sm:$0xf0] }
  0xbd   :  { %2491 = vmatpush.bf16.msra.mxu2 %v3277_v43  ;;  %v4111_v43 = vld [vmem:[%s6574_s1 + $0xa4] sm:$0xf] }
  0xbe   :  { %2504 = vmatpush.bf16.msra.mxu3 %v3565_v46  ;;  %v3853_v46 = vor.u32 %v4363_v38, %v3850_v39  ;;  %v2845_v53 = vor.u32 %v4111_v43, %v2842_v44  ;;  %v2215_v59 = vpop.f32.mrf.mxu0  ;;  %v4327_v39 = vld [vmem:[%s6574_s1 + $0x764] sm:$0xf]  ;;  %v2956_v43 = vld [vmem:[%s6574_s1 + $0x180] sm:$0xf] }
  0xbf   :  { %2478 = vmatpush.bf16.msra.mxu1 %v2989_v51  ;;  %v4354_v51 = vld [vmem:[%s6574_s1 + $0x83c] sm:$0xf]  ;;  %v4143_v44 = vld [vmem:[%s6574_s1 + $0x1a0] sm:$0xf0] }
  0xc0   :  { %2469 = vmatpush.bf16.msra.mxu0 %v3993_v58  ;;  %v4102_v58 = vld [vmem:[%s6574_s1 + $0x5c] sm:$0xf]  ;;  %v3817_v0 = vor.u32 %v4354_v51, %v3814_v52  ;;  %v4399_v51 = vld [vmem:[%s6574_s1 + $0x9a4] sm:$0xf]  ;;  %v3994_v52 = vld [vmem:[%s6574_s1 + $0x9c4] sm:$0xf0]  ;;  %v2957_v55 = vor.u32 %v4143_v44, %v2956_v43 }
  0xc1   :  { %2492 = vmatpush.bf16.msra.mxu2 %v3241_v62  ;;  %v3058_v62 = vld [vmem:[%s6574_s1 + $0x274] sm:$0xf0] }
  0xc2   :  { %2505 = vmatpush.bf16.msra.mxu3 %v3529_v1  ;;  %v4345_v1 = vld [vmem:[%s6574_s1 + $0x7f4] sm:$0xf]  ;;  %v3061_v18 = vor.u32 %v4165_v61, %v3058_v62  ;;  %v2920_v61 = vld [vmem:[%s6574_s1 + $0x138] sm:$0xf]  ;;  %v4134_v62 = vld [vmem:[%s6574_s1 + $0x158] sm:$0xf0] }
  0xc3   :  { %2479 = vmatpush.bf16.msra.mxu1 %v2953_v7  ;;  %v4161_v7 = vld [vmem:[%s6574_s1 + $0x230] sm:$0xf0]  ;;  %v2226_v26 = vpop.f32.mrf.mxu1  ;;  %v2921_v9 = vor.u32 %v4134_v62, %v2920_v61  ;;  %v2776_v62 = vld [vmem:[%s6574_s1 + $0x18] sm:$0xf] }
  0xc4   :  { %2470 = vmatpush.bf16.msra.mxu0 %v3957_v11  ;;  %v2809_v11 = vor.u32 %v4102_v58, %v2806_v60  ;;  %v3029_v22 = vor.u32 %v4161_v7, %v3028_v5  ;;  %v2227_v37 = vadd.f32 %v2226_v26, %v393_v21  ;;  %v3670_v58 = vld [vmem:[%s6574_s1 + $0x73c] sm:$0xf0]  ;;  %v4390_v5 = vld [vmem:[%s6574_s1 + $0x95c] sm:$0xf]  ;;  %v4197_v21 = vld [vmem:[%s6574_s1 + $0x350] sm:$0xf0] }
  0xc5   :  { %2493 = vmatpush.bf16.msra.mxu2 %v3205_v15  ;;  %v2770_v15 = vld [vmem:[%s6574_s1 + $0x34] sm:$0xf0] }
  0xc6   :  { %2506 = vmatpush.bf16.msra.mxu3 %v3493_v19  ;;  %v3781_v19 = vor.u32 %v4345_v1, %v3778_v2  ;;  %v2773_v27 = vor.u32 %v4093_v14, %v2770_v15  ;;  %v4206_v1 = vld [vmem:[%s6574_s1 + $0x398] sm:$0xf0]  ;;  %v3673_v2 = vor.u32 %v4318_v57, %v3670_v58  ;;  %v4125_v15 = vld [vmem:[%s6574_s1 + $0x110] sm:$0xf0]  ;;  %v4072_v58 = vld [vmem:[%s6574_s1 + $0xa38] sm:$0xf] }
  0xc7   :  { %2480 = vmatpush.bf16.msra.mxu1 %v2917_v24  ;;  %v4336_v24 = vld [vmem:[%s6574_s1 + $0x7ac] sm:$0xf]  ;;  %v2239_v41 = vpop.f32.mrf.mxu2 }
  0xc8   :  { %2471 = vmatpush.bf16.msra.mxu0 %v3921_v29  ;;  %v2992_v29 = vld [vmem:[%s6574_s1 + $0x1c8] sm:$0xf] }
  0xc9   :  { %2494 = vmatpush.bf16.msra.mxu2 %v3169_v33  ;;  %v2141_v33 = vsel %vm2124_vm0, %v4069_v20, 0  ;;  %v2993_v38 = vor.u32 %v4152_v30, %v2992_v29  ;;  %v3172_v20 = vld [vmem:[%s6574_s1 + $0x330] sm:$0xf]  ;;  %v2848_v29 = vld [vmem:[%s6574_s1 + $0xa8] sm:$0xf] }
  0xca   :  { %2507 = vmatpush.bf16.msra.mxu3 %v3457_v36  ;;  %v4030_v36 = vld [vmem:[%s6574_s1 + $0xa0c] sm:$0xf0]  ;;  %v3173_v32 = vor.u32 %v4197_v21, %v3172_v20  ;;  %v4269_v21 = vld [vmem:[%s6574_s1 + $0x590] sm:$0xf0] }
  0xcb   :  { %2481 = vmatpush.bf16.msra.mxu1 %v2881_v40  ;;  %4086 = vmatmul.msk.bf16.vlgmr.msra.gmra.mxu0 %vm2120_vm1, %v4804_v50  ;;  %v3706_v40 = vld [vmem:[%s6574_s1 + $0x784] sm:$0xf0]  ;;  %v2228_v59 = vpop.f32.mrf.mxu1  ;;  %v3892_v30 = vld [vmem:[%s6574_s1 + $0x8d0] sm:$0xf] }
  0xcc   :  { %2516 = vmatpush.bf16.msrb.mxu0 %v3889_v34  ;;  %v3745_v34 = vor.u32 %v4336_v24, %v3742_v25  ;;  %v3709_v49 = vor.u32 %v4327_v39, %v3706_v40  ;;  %v4381_v24 = vld [vmem:[%s6574_s1 + $0x914] sm:$0xf]  ;;  %v3922_v25 = vld [vmem:[%s6574_s1 + $0x934] sm:$0xf0]  ;;  %v4188_v39 = vld [vmem:[%s6574_s1 + $0x308] sm:$0xf0] }
  0xcd   :  { %2495 = vmatpush.bf16.msra.mxu2 %v3133_v45  ;;  %v2252_v45 = vpop.f32.mrf.mxu3  ;;  %v4422_v59 = vld [vmem:[%s6574_s1 + $0xa58] sm:$0x30]  ;;  %v3460_v20 = vld [vmem:[%s6574_s1 + $0x570] sm:$0xf] }
  0xce   :  { %2508 = vmatpush.bf16.msra.mxu3 %v3421_v48  ;;  %v4215_v48 = vld [vmem:[%s6574_s1 + $0x3e0] sm:$0xf0] }
  0xcf   :  { %2482 = vmatpush.bf16.msra.mxu1 %v2845_v53  ;;  %v2240_v53 = vadd.f32 %v2239_v41, %v2227_v37  ;;  %v3245_v60 = vor.u32 %v4215_v48, %v3244_v47  ;;  %v2241_v13 = vpop.f32.mrf.mxu2  ;;  %v3925_v37 = vor.u32 %v4381_v24, %v3922_v25  ;;  %v3893_v41 = vor.u32 %v4377_v31, %v3892_v30  ;;  %v4107_v48 = vld [vmem:[%s6574_s1 + $0x80] sm:$0xf0]  ;;  %v4036_v24 = vld [vmem:[%s6574_s1 + $0x9f0] sm:$0xf]  ;;  %v4413_v25 = vld [vmem:[%s6574_s1 + $0xa10] sm:$0xf0] }
  0xd0   :  { %2517 = vmatpush.bf16.msrb.mxu0 %v3853_v46  ;;  %v4033_v46 = vor.u32 %v4408_v35, %v4030_v36  ;;  %v4296_v35 = vld [vmem:[%s6574_s1 + $0x668] sm:$0xf0]  ;;  %v4157_v13 = vld [vmem:[%s6574_s1 + $0x214] sm:$0xf]  ;;  %v3748_v30 = vld [vmem:[%s6574_s1 + $0x7b0] sm:$0xf] }
  0xd1   :  { %2496 = vmatpush.bf16.msra.mxu2 %v3097_v63  ;;  %v3997_v63 = vor.u32 %v4399_v51, %v3994_v52  ;;  %v2253_v7 = vadd.f32 %v2252_v45, %v2240_v53  ;;  %v3856_v45 = vld [vmem:[%s6574_s1 + $0x888] sm:$0xf]  ;;  %v4287_v51 = vld [vmem:[%s6574_s1 + $0x620] sm:$0xf0]  ;;  %v3100_v52 = vld [vmem:[%s6574_s1 + $0x2a0] sm:$0xf] }
  0xd2   :  { %2509 = vmatpush.bf16.msra.mxu3 %v3385_v6  ;;  %v3958_v6 = vld [vmem:[%s6574_s1 + $0x97c] sm:$0xf0]  ;;  %v4179_v53 = vld [vmem:[%s6574_s1 + $0x2c0] sm:$0xf0]  ;;  %v4341_v31 = vld [vmem:[%s6574_s1 + $0x7d0] sm:$0xf0] }
  0xd3   :  { %2483 = vmatpush.bf16.msra.mxu1 %v2809_v11  ;;  %v3634_v11 = vld [vmem:[%s6574_s1 + $0x6f4] sm:$0xf0] }
  0xd4   :  { %2518 = vmatpush.bf16.msrb.mxu0 %v3817_v0  ;;  %v3208_v0 = vld [vmem:[%s6574_s1 + $0x378] sm:$0xf] }
  0xd5   :  { %2497 = vmatpush.bf16.msra.mxu2 %v3061_v18  ;;  %v3209_v14 = vor.u32 %v4206_v1, %v3208_v0  ;;  %v2254_v18 = vpop.f32.mrf.mxu3  ;;  %v4359_v0 = vld [vmem:[%s6574_s1 + $0x860] sm:$0xf0]  ;;  %v3101_v1 = vor.u32 %v4179_v53, %v3100_v52  ;;  %v3964_v52 = vld [vmem:[%s6574_s1 + $0x960] sm:$0xf] }
  0xd6   :  { %2510 = vmatpush.bf16.msra.mxu3 %v3349_v23  ;;  %v3637_v23 = vor.u32 %v4309_v10, %v3634_v11  ;;  %v3064_v10 = vld [vmem:[%s6574_s1 + $0x258] sm:$0xf]  ;;  %v4170_v11 = vld [vmem:[%s6574_s1 + $0x278] sm:$0xf0]  ;;  %v4395_v53 = vld [vmem:[%s6574_s1 + $0x980] sm:$0xf0] }
  0xd7   :  { %2484 = vmatpush.bf16.msra.mxu1 %v2773_v27  ;;  %v2885_v27 = vor.u32 %v4125_v15, %v2884_v12  ;;  %v2278_v36 = vpop.f32.mrf.mxu1  ;;  %v4350_v18 = vld [vmem:[%s6574_s1 + $0x818] sm:$0xf0] }
  0xd8   :  { %2519 = vmatpush.bf16.msrb.mxu0 %v3781_v19  ;;  %2498 = vmatmul.bf16.vlgmr.msra.gmra.mxu2 %v4709_v4  ;;  %v3961_v19 = vor.u32 %v4390_v5, %v3958_v6  ;;  %v3496_v5 = vld [vmem:[%s6574_s1 + $0x5b8] sm:$0xf]  ;;  %v4278_v6 = vld [vmem:[%s6574_s1 + $0x5d8] sm:$0xf0] }
  0xd9   :  { %2542 = vmatpush.bf16.msrb.mxu2 %v3029_v22  ;;  %2511 = vmatmul.bf16.vlgmr.msra.gmra.mxu3 %v4707_v3  ;;  %v2265_v22 = vpop.f32.mrf.mxu0 }
  0xda   :  { %2555 = vmatpush.bf16.msrb.mxu3 %v3317_v28  ;;  %2485 = vmatmul.bf16.vlgmr.msra.gmra.mxu1 %v4684_v54  ;;  %v2266_v26 = vadd.f32 %v2265_v22, %v2253_v7  ;;  %v3605_v28 = vor.u32 %v4305_v17, %v3604_v16  ;;  %v3497_v16 = vor.u32 %v4278_v6, %v3496_v5  ;;  %v3784_v17 = vld [vmem:[%s6574_s1 + $0x7f8] sm:$0xf]  ;;  %v4386_v5 = vld [vmem:[%s6574_s1 + $0x938] sm:$0xf0] }
  0xdb   :  { %2532 = vmatpush.bf16.msrb.mxu1 %v2141_v33  ;;  %v4116_v33 = vld [vmem:[%s6574_s1 + $0xc8] sm:$0xf0] }
  0xdc   :  { %2520 = vmatpush.bf16.msrb.mxu0 %v3745_v34  ;;  %v3568_v34 = vld [vmem:[%s6574_s1 + $0x648] sm:$0xf]  ;;  %v2279_v40 = vadd.f32 %v2278_v36, %v2266_v26  ;;  %v2849_v43 = vor.u32 %v4116_v33, %v2848_v29  ;;  %v3785_v26 = vor.u32 %v4350_v18, %v3784_v17  ;;  %v3461_v29 = vor.u32 %v4269_v21, %v3460_v20  ;;  %v4314_v20 = vld [vmem:[%s6574_s1 + $0x6f8] sm:$0xf0] }
  0xdd   :  { %2543 = vmatpush.bf16.msrb.mxu2 %v2993_v38  ;;  %v3136_v38 = vld [vmem:[%s6574_s1 + $0x2e8] sm:$0xf]  ;;  %v3569_v44 = vor.u32 %v4296_v35, %v3568_v34  ;;  %v4037_v33 = vor.u32 %v4413_v25, %v4036_v24  ;;  %v4260_v35 = vld [vmem:[%s6574_s1 + $0x548] sm:$0xf0]  ;;  %v4301_v24 = vld [vmem:[%s6574_s1 + $0x694] sm:$0xf] }
  0xde   :  { %2556 = vmatpush.bf16.msrb.mxu3 %v3281_v42  ;;  %v2812_v42 = vld [vmem:[%s6574_s1 + $0x60] sm:$0xf]  ;;  %2738 = vst [vmem:[%s6577_s3 + $0x8] sm:$0xff] %v2279_v40  ;;  %v3137_v47 = vor.u32 %v4188_v39, %v3136_v38  ;;  %v3424_v34 = vld [vmem:[%s6574_s1 + $0x528] sm:$0xf]  ;;  %v3749_v40 = vor.u32 %v4341_v31, %v3748_v30 }
  0xdf   :  { %2533 = vmatpush.bf16.msrb.mxu1 %v4033_v46  ;;  %v4368_v46 = vld [vmem:[%s6574_s1 + $0x8a8] sm:$0xf0]  ;;  %v2280_v7 = vpop.f32.mrf.mxu1  ;;  %v4000_v38 = vld [vmem:[%s6574_s1 + $0x9a8] sm:$0xf]  ;;  %v3606_v25 = vld [vmem:[%s6574_s1 + $0x6b4] sm:$0xf0] }
  0xe0   :  { %2521 = vmatpush.bf16.msrb.mxu0 %v3709_v49  ;;  %v3532_v49 = vld [vmem:[%s6574_s1 + $0x600] sm:$0xf]  ;;  %v3857_v57 = vor.u32 %v4368_v46, %v3856_v45  ;;  %v4332_v45 = vld [vmem:[%s6574_s1 + $0x788] sm:$0xf0] }
  0xe1   :  { %2544 = vmatpush.bf16.msrb.mxu2 %v2957_v55  ;;  %v2267_v55 = vpop.f32.mrf.mxu0  ;;  %v3533_v61 = vor.u32 %v4287_v51, %v3532_v49  ;;  %v4251_v49 = vld [vmem:[%s6574_s1 + $0x500] sm:$0xf0]  ;;  %v4364_v30 = vld [vmem:[%s6574_s1 + $0x88c] sm:$0xf] }
  0xe2   :  { %2557 = vmatpush.bf16.msrb.mxu3 %v3245_v60  ;;  %v2813_v60 = vor.u32 %v4107_v48, %v2812_v42  ;;  %v2958_v42 = vld [vmem:[%s6574_s1 + $0x1a4] sm:$0xf0]  ;;  %v3388_v48 = vld [vmem:[%s6574_s1 + $0x4e0] sm:$0xf] }
  0xe3   :  { %2534 = vmatpush.bf16.msrb.mxu1 %v3997_v63  ;;  %v3820_v63 = vld [vmem:[%s6574_s1 + $0x840] sm:$0xf] }
  0xe4   :  { %2522 = vmatpush.bf16.msrb.mxu0 %v3673_v2  ;;  %v4098_v2 = vld [vmem:[%s6574_s1 + $0x38] sm:$0xf0]  ;;  %v3821_v12 = vor.u32 %v4359_v0, %v3820_v63  ;;  %v3965_v0 = vor.u32 %v4395_v53, %v3964_v52  ;;  %v4283_v53 = vld [vmem:[%s6574_s1 + $0x604] sm:$0xf] }
  0xe5   :  { %2545 = vmatpush.bf16.msrb.mxu2 %v2921_v9  ;;  %v4073_v9 = vor.u32 %v4422_v59, %v4072_v58  ;;  %v2777_v15 = vor.u32 %v4098_v2, %v2776_v62  ;;  %v2922_v58 = vld [vmem:[%s6574_s1 + $0x15c] sm:$0xf0]  ;;  %v3389_v59 = vor.u32 %v4251_v49, %v3388_v48  ;;  %v3352_v62 = vld [vmem:[%s6574_s1 + $0x498] sm:$0xf]  ;;  %v2814_v48 = vld [vmem:[%s6574_s1 + $0x84] sm:$0xf0] }
  0xe6   :  { %2558 = vmatpush.bf16.msrb.mxu3 %v3209_v14  ;;  %v3030_v14 = vld [vmem:[%s6574_s1 + $0x234] sm:$0xf0] }
  0xe7   :  { %2535 = vmatpush.bf16.msrb.mxu1 %v3961_v19  ;;  %v3065_v19 = vor.u32 %v4170_v11, %v3064_v10  ;;  %v2144_v22 = vsel %vm2124_vm0, %v4073_v9, 0  ;;  %v2291_v36 = vpop.f32.mrf.mxu2  ;;  %v3928_v2 = vld [vmem:[%s6574_s1 + $0x918] sm:$0xf]  ;;  %v4229_v9 = vld [vmem:[%s6574_s1 + $0x454] sm:$0xf] }
  0xe8   :  { %2523 = vmatpush.bf16.msrb.mxu0 %v3637_v23  ;;  %v3033_v23 = vor.u32 %v4157_v13, %v3030_v14  ;;  %v2304_v39 = vpop.f32.mrf.mxu3  ;;  %v3318_v10 = vld [vmem:[%s6574_s1 + $0x474] sm:$0xf0]  ;;  %v4373_v11 = vld [vmem:[%s6574_s1 + $0x8d4] sm:$0xf] }
  0xe9   :  { %2546 = vmatpush.bf16.msrb.mxu2 %v2885_v27  ;;  %v4148_v27 = vld [vmem:[%s6574_s1 + $0x1cc] sm:$0xf]  ;;  %v3894_v14 = vld [vmem:[%s6574_s1 + $0x8f4] sm:$0xf0] }
  0xea   :  { %2559 = vmatpush.bf16.msrb.mxu3 %v3173_v32  ;;  %v394_v32 = vperm.slane %v5543_v56, 2  ;;  %v4404_v56 = vld [vmem:[%s6574_s1 + $0x9c8] sm:$0xf0] }
  0xeb   :  { %2536 = vmatpush.bf16.msrb.mxu1 %v3925_v37  ;;  %2524 = vmatmul.bf16.vlgmr.msrb.gmra.mxu0 %v4718_v8 }
  0xec   :  { %2568 = vmatpush.bf16.msra.mxu0 %v3605_v28  ;;  %v2994_v28 = vld [vmem:[%s6574_s1 + $0x1ec] sm:$0xf0]  ;;  %v2292_v46 = vadd.f32 %v2291_v36, %v394_v32  ;;  %v3609_v36 = vor.u32 %v4301_v24, %v3606_v25  ;;  %v4265_v25 = vld [vmem:[%s6574_s1 + $0x574] sm:$0xf] }
  0xed   :  { %2547 = vmatpush.bf16.msrb.mxu2 %v2849_v43  ;;  %v2997_v37 = vor.u32 %v4148_v27, %v2994_v28  ;;  %v3425_v43 = vor.u32 %v4260_v35, %v3424_v34  ;;  %v4220_v28 = vld [vmem:[%s6574_s1 + $0x40c] sm:$0xf]  ;;  %v3858_v32 = vld [vmem:[%s6574_s1 + $0x8ac] sm:$0xf0] }
  0xee   :  { %2560 = vmatpush.bf16.msrb.mxu3 %v3137_v47  ;;  %4087 = vmatmul.msk.bf16.vlgmr.msrb.gmra.mxu1 %vm2120_vm1, %v4804_v50  ;;  %v4001_v47 = vor.u32 %v4404_v56, %v4000_v38  ;;  %v2305_v63 = vadd.f32 %v2304_v39, %v2292_v46  ;;  %v2850_v34 = vld [vmem:[%s6574_s1 + $0xcc] sm:$0xf0]  ;;  %v4292_v56 = vld [vmem:[%s6574_s1 + $0x64c] sm:$0xf]  ;;  %v3822_v46 = vld [vmem:[%s6574_s1 + $0x864] sm:$0xf0] }
  0xef   :  { %2581 = vmatpush.bf16.msra.mxu1 %v3893_v41  ;;  %v4139_v41 = vld [vmem:[%s6574_s1 + $0x184] sm:$0xf]  ;;  %v2293_v6 = vpop.f32.mrf.mxu2  ;;  %v3570_v39 = vld [vmem:[%s6574_s1 + $0x66c] sm:$0xf0] }
  0xf0   :  { %2569 = vmatpush.bf16.msra.mxu0 %v3569_v44  ;;  %v3712_v44 = vld [vmem:[%s6574_s1 + $0x768] sm:$0xf]  ;;  %v2961_v51 = vor.u32 %v4139_v41, %v2958_v42  ;;  %v4211_v42 = vld [vmem:[%s6574_s1 + $0x3c4] sm:$0xf]  ;;  %v3573_v52 = vor.u32 %v4292_v56, %v3570_v39  ;;  %v3426_v56 = vld [vmem:[%s6574_s1 + $0x54c] sm:$0xf0] }
  0xf1   :  { %2548 = vmatpush.bf16.msrb.mxu2 %v2813_v60  ;;  %v3713_v55 = vor.u32 %v4332_v45, %v3712_v44  ;;  %v3676_v60 = vld [vmem:[%s6574_s1 + $0x720] sm:$0xf]  ;;  %v4355_v44 = vld [vmem:[%s6574_s1 + $0x844] sm:$0xf] }
  0xf2   :  { %2561 = vmatpush.bf16.msrb.mxu3 %v3101_v1  ;;  %v4242_v1 = vld [vmem:[%s6574_s1 + $0x4b8] sm:$0xf0] }
  0xf3   :  { %2582 = vmatpush.bf16.msra.mxu1 %v3857_v57  ;;  %v4130_v57 = vld [vmem:[%s6574_s1 + $0x13c] sm:$0xf]  ;;  %v3353_v18 = vor.u32 %v4242_v1, %v3352_v62  ;;  %v3786_v1 = vld [vmem:[%s6574_s1 + $0x81c] sm:$0xf0] }
  0xf4   :  { %2570 = vmatpush.bf16.msra.mxu0 %v3533_v61  ;;  %v4323_v61 = vld [vmem:[%s6574_s1 + $0x740] sm:$0xf0]  ;;  %v2925_v7 = vor.u32 %v4130_v57, %v2922_v58  ;;  %v2317_v17 = vpop.f32.mrf.mxu0  ;;  %v4418_v58 = vld [vmem:[%s6574_s1 + $0xa3c] sm:$0xf] }
  0xf5   :  { %2549 = vmatpush.bf16.msrb.mxu2 %v2777_v15  ;;  %v3677_v13 = vor.u32 %v4323_v61, %v3676_v60  ;;  %v4121_v15 = vld [vmem:[%s6574_s1 + $0xf4] sm:$0xf]  ;;  %v2318_v21 = vadd.f32 %v2317_v17, %v2305_v63  ;;  %v3825_v60 = vor.u32 %v4355_v44, %v3822_v46  ;;  %v4202_v62 = vld [vmem:[%s6574_s1 + $0x37c] sm:$0xf]  ;;  %v3210_v63 = vld [vmem:[%s6574_s1 + $0x39c] sm:$0xf0] }
  0xf6   :  { %2562 = vmatpush.bf16.msrb.mxu3 %v3065_v19  ;;  %v3640_v19 = vld [vmem:[%s6574_s1 + $0x6d8] sm:$0xf]  ;;  %v3678_v44 = vld [vmem:[%s6574_s1 + $0x744] sm:$0xf0] }
  0xf7   :  { %2583 = vmatpush.bf16.msra.mxu1 %v3821_v12  ;;  %v2306_v12 = vpop.f32.mrf.mxu3  ;;  %v3641_v31 = vor.u32 %v4314_v20, %v3640_v19  ;;  %v2330_v35 = vpop.f32.mrf.mxu1  ;;  %v3750_v19 = vld [vmem:[%s6574_s1 + $0x7d4] sm:$0xf0] }
  0xf8   :  { %2571 = vmatpush.bf16.msra.mxu0 %v3497_v16  ;;  %2550 = vmatmul.bf16.vlgmr.msrb.gmra.mxu2 %v4684_v54  ;;  %v2886_v16 = vld [vmem:[%s6574_s1 + $0x114] sm:$0xf0]  ;;  %v3498_v12 = vld [vmem:[%s6574_s1 + $0x5dc] sm:$0xf0] }
  0xf9   :  { %2597 = vmatpush.bf16.msra.mxu2 %v2144_v22  ;;  %2563 = vmatmul.bf16.vlgmr.msrb.gmra.mxu3 %v4709_v4  ;;  %v3929_v22 = vor.u32 %v4386_v5, %v3928_v2  ;;  %v2889_v27 = vor.u32 %v4121_v15, %v2886_v16  ;;  %v4094_v2 = vld [vmem:[%s6574_s1 + $0x1c] sm:$0xf]  ;;  %v2778_v5 = vld [vmem:[%s6574_s1 + $0x3c] sm:$0xf0]  ;;  %v4193_v15 = vld [vmem:[%s6574_s1 + $0x334] sm:$0xf] }
  0xfa   :  { %2607 = vmatpush.bf16.msra.mxu3 %v3033_v23  ;;  %v3321_v23 = vor.u32 %v4229_v9, %v3318_v10  ;;  %v3213_v10 = vor.u32 %v4202_v62, %v3210_v63  ;;  %v3174_v16 = vld [vmem:[%s6574_s1 + $0x354] sm:$0xf0]  ;;  %v4162_v63 = vld [vmem:[%s6574_s1 + $0x238] sm:$0xf0] }
  0xfb   :  { %2584 = vmatpush.bf16.msra.mxu1 %v3785_v26  ;;  %v3897_v26 = vor.u32 %v4373_v11, %v3894_v14  ;;  %v2343_v45 = vpop.f32.mrf.mxu2  ;;  %v4274_v11 = vld [vmem:[%s6574_s1 + $0x5bc] sm:$0xf]  ;;  %v2781_v14 = vor.u32 %v4094_v2, %v2778_v5  ;;  %v3177_v24 = vor.u32 %v4193_v15, %v3174_v16 }
  0xfc   :  { %2572 = vmatpush.bf16.msra.mxu0 %v3461_v29  ;;  %v3282_v29 = vld [vmem:[%s6574_s1 + $0x42c] sm:$0xf0] }
  0xfd   :  { %2598 = vmatpush.bf16.msra.mxu2 %v4037_v33  ;;  %v4112_v33 = vld [vmem:[%s6574_s1 + $0xac] sm:$0xf]  ;;  %v3285_v38 = vor.u32 %v4220_v28, %v3282_v29  ;;  %v3138_v29 = vld [vmem:[%s6574_s1 + $0x30c] sm:$0xf0] }
  0xfe   :  { %2608 = vmatpush.bf16.msra.mxu3 %v2997_v37  ;;  %v2331_v37 = vadd.f32 %v2330_v35, %v2318_v21  ;;  %v2853_v41 = vor.u32 %v4112_v33, %v2850_v34  ;;  %v3501_v21 = vor.u32 %v4274_v11, %v3498_v12  ;;  %v4184_v28 = vld [vmem:[%s6574_s1 + $0x2ec] sm:$0xf]  ;;  %v3354_v12 = vld [vmem:[%s6574_s1 + $0x4bc] sm:$0xf0] }
  0xff   :  { %2585 = vmatpush.bf16.msra.mxu1 %v3749_v40  ;;  %v3861_v40 = vor.u32 %v4364_v30, %v3858_v32  ;;  %v2332_v6 = vpop.f32.mrf.mxu1  ;;  %v3714_v32 = vld [vmem:[%s6574_s1 + $0x78c] sm:$0xf0]  ;;  %v4400_v35 = vld [vmem:[%s6574_s1 + $0x9ac] sm:$0xf] }
 0x100   :  { %2573 = vmatpush.bf16.msra.mxu0 %v3425_v43  ;;  %v3246_v43 = vld [vmem:[%s6574_s1 + $0x3e4] sm:$0xf0]  ;;  %v2344_v49 = vadd.f32 %v2343_v45, %v2331_v37  ;;  %v3141_v37 = vor.u32 %v4184_v28, %v3138_v29  ;;  %v4391_v45 = vld [vmem:[%s6574_s1 + $0x964] sm:$0xf] }
 0x101   :  { %2599 = vmatpush.bf16.msra.mxu2 %v4001_v47  ;;  %v4103_v47 = vld [vmem:[%s6574_s1 + $0x64] sm:$0xf]  ;;  %v3249_v57 = vor.u32 %v4211_v42, %v3246_v43 }
 0x102   :  { %2609 = vmatpush.bf16.msra.mxu3 %v2961_v51  ;;  %v2319_v51 = vpop.f32.mrf.mxu0  ;;  %2739 = vst [vmem:[%s6577_s3 + $0x10] sm:$0xff] %v2344_v49  ;;  %v2817_v61 = vor.u32 %v4103_v47, %v2814_v48  ;;  %v4319_v43 = vld [vmem:[%s6574_s1 + $0x724] sm:$0xf]  ;;  %v3966_v47 = vld [vmem:[%s6574_s1 + $0x984] sm:$0xf0] }
 0x103   :  { %2586 = vmatpush.bf16.msra.mxu1 %v3713_v55  ;;  %v3534_v55 = vld [vmem:[%s6574_s1 + $0x624] sm:$0xf0]  ;;  %v2345_v17 = vpop.f32.mrf.mxu2  ;;  %v4247_v48 = vld [vmem:[%s6574_s1 + $0x4e4] sm:$0xf]  ;;  %v3969_v62 = vor.u32 %v4391_v45, %v3966_v47  ;;  %v4360_v47 = vld [vmem:[%s6574_s1 + $0x868] sm:$0xf0] }
 0x104   :  { %2574 = vmatpush.bf16.msra.mxu0 %v3389_v59  ;;  %v4074_v59 = vld [vmem:[%s6574_s1 + $0xa5c] sm:$0x30]  ;;  %v3324_v17 = vld [vmem:[%s6574_s1 + $0x458] sm:$0xf] }
 0x105   :  { %2600 = vmatpush.bf16.msra.mxu2 %v3965_v0  ;;  %v4346_v0 = vld [vmem:[%s6574_s1 + $0x7fc] sm:$0xf]  ;;  %v4077_v9 = vor.u32 %v4418_v58, %v4074_v59  ;;  %v6285_v49 = vld [vmem:[%s6576_s2] sm:$0xff]  ;;  %v3681_v58 = vor.u32 %v4319_v43, %v3678_v44 }
 0x106   :  { %2610 = vmatpush.bf16.msra.mxu3 %v2925_v7  ;;  %v3537_v7 = vor.u32 %v4283_v53, %v3534_v55  ;;  %v395_v51 = vperm.slane %v6285_v49, 3  ;;  %v3390_v53 = vld [vmem:[%s6574_s1 + $0x504] sm:$0xf0]  ;;  %v4166_v55 = vld [vmem:[%s6574_s1 + $0x25c] sm:$0xf] }
 0x107   :  { %2587 = vmatpush.bf16.msra.mxu1 %v3677_v13  ;;  %v3789_v13 = vor.u32 %v4346_v0, %v3786_v1  ;;  %v2147_v20 = vsel %vm2124_vm0, %v4077_v9, 0  ;;  %v4310_v59 = vld [vmem:[%s6574_s1 + $0x6dc] sm:$0xf]  ;;  %v3612_v0 = vld [vmem:[%s6574_s1 + $0x698] sm:$0xf]  ;;  %v3393_v5 = vor.u32 %v4247_v48, %v3390_v53 }
 0x108   :  { %2575 = vmatpush.bf16.msra.mxu0 %v3353_v18  ;;  %v4337_v18 = vld [vmem:[%s6574_s1 + $0x7b4] sm:$0xf]  ;;  %v2356_v33 = vpop.f32.mrf.mxu3  ;;  %v4306_v1 = vld [vmem:[%s6574_s1 + $0x6b8] sm:$0xf0]  ;;  %v3930_v9 = vld [vmem:[%s6574_s1 + $0x93c] sm:$0xf0] }
 0x109   :  { %2601 = vmatpush.bf16.msra.mxu2 %v3929_v22  ;;  %v4409_v22 = vld [vmem:[%s6574_s1 + $0x9f4] sm:$0xf]  ;;  %v2357_v6 = vadd.f32 %v2356_v33, %v395_v51  ;;  %v3252_v51 = vld [vmem:[%s6574_s1 + $0x3c8] sm:$0xf] }
 0x10a   :  { %2611 = vmatpush.bf16.msra.mxu3 %v2889_v27  ;;  %v3753_v27 = vor.u32 %v4337_v18, %v3750_v19  ;;  %v4234_v18 = vld [vmem:[%s6574_s1 + $0x478] sm:$0xf0]  ;;  %v3613_v19 = vor.u32 %v4306_v1, %v3612_v0  ;;  %v3792_v1 = vld [vmem:[%s6574_s1 + $0x800] sm:$0xf] }
 0x10b   :  { %2588 = vmatpush.bf16.msra.mxu1 %v3641_v31  ;;  %2576 = vmatmul.bf16.vlgmr.msra.gmra.mxu0 %v4707_v3  ;;  %v4328_v31 = vld [vmem:[%s6574_s1 + $0x76c] sm:$0xf] }
 0x10c   :  { %2620 = vmatpush.bf16.msrb.mxu0 %v3321_v23  ;;  %4088 = vmatmul.msk.bf16.vlgmr.msra.gmra.mxu2 %vm2120_vm1, %v4804_v50  ;;  %v4038_v23 = vld [vmem:[%s6574_s1 + $0xa14] sm:$0xf0]  ;;  %v3717_v39 = vor.u32 %v4328_v31, %v3714_v32  ;;  %v3864_v31 = vld [vmem:[%s6574_s1 + $0x890] sm:$0xf]  ;;  %v4369_v32 = vld [vmem:[%s6574_s1 + $0x8b0] sm:$0xf0] }
 0x10d   :  { %2646 = vmatpush.bf16.msrb.mxu2 %v3897_v26  ;;  %v3462_v26 = vld [vmem:[%s6574_s1 + $0x594] sm:$0xf0]  ;;  %v4041_v30 = vor.u32 %v4409_v22, %v4038_v23  ;;  %v4153_v22 = vld [vmem:[%s6574_s1 + $0x1f0] sm:$0xf0] }
 0x10e   :  { %2612 = vmatpush.bf16.msra.mxu3 %v2853_v41  ;;  %2589 = vmatmul.bf16.vlgmr.msra.gmra.mxu1 %v4718_v8  ;;  %v3465_v34 = vor.u32 %v4265_v25, %v3462_v26  ;;  %v3102_v41 = vld [vmem:[%s6574_s1 + $0x2c4] sm:$0xf0]  ;;  %v3576_v26 = vld [vmem:[%s6574_s1 + $0x650] sm:$0xf] }
 0x10f   :  { %2633 = vmatpush.bf16.msrb.mxu1 %v3609_v36  ;;  %v4002_v36 = vld [vmem:[%s6574_s1 + $0x9cc] sm:$0xf0] }
 0x110   :  { %2621 = vmatpush.bf16.msrb.mxu0 %v3285_v38  ;;  %v4256_v38 = vld [vmem:[%s6574_s1 + $0x52c] sm:$0xf]  ;;  %v4005_v42 = vor.u32 %v4400_v35, %v4002_v36  ;;  %v2358_v2 = vpop.f32.mrf.mxu3  ;;  %v4225_v35 = vld [vmem:[%s6574_s1 + $0x430] sm:$0xf0] }
 0x111   :  { %2647 = vmatpush.bf16.msrb.mxu2 %v3861_v40  ;;  %v4175_v40 = vld [vmem:[%s6574_s1 + $0x2a4] sm:$0xf]  ;;  %v3429_v46 = vor.u32 %v4256_v38, %v3426_v56  ;;  %v2964_v38 = vld [vmem:[%s6574_s1 + $0x188] sm:$0xf]  ;;  %v4144_v56 = vld [vmem:[%s6574_s1 + $0x1a8] sm:$0xf0] }
 0x112   :  { %2613 = vmatpush.bf16.msra.mxu3 %v2817_v61  ;;  %v3036_v61 = vld [vmem:[%s6574_s1 + $0x218] sm:$0xf]  ;;  %v2965_v48 = vor.u32 %v4144_v56, %v2964_v38  ;;  %v4351_v2 = vld [vmem:[%s6574_s1 + $0x820] sm:$0xf0]  ;;  %v3396_v56 = vld [vmem:[%s6574_s1 + $0x4e8] sm:$0xf] }
 0x113   :  { %2634 = vmatpush.bf16.msrb.mxu1 %v3573_v52  ;;  %v3105_v52 = vor.u32 %v4175_v40, %v3102_v41  ;;  %v3037_v16 = vor.u32 %v4162_v63, %v3036_v61  ;;  %v3865_v40 = vor.u32 %v4369_v32, %v3864_v31  ;;  %v3540_v41 = vld [vmem:[%s6574_s1 + $0x608] sm:$0xf]  ;;  %v3504_v61 = vld [vmem:[%s6574_s1 + $0x5c0] sm:$0xf]  ;;  %v4333_v31 = vld [vmem:[%s6574_s1 + $0x790] sm:$0xf0] }
 0x114   :  { %2622 = vmatpush.bf16.msrb.mxu0 %v3249_v57  ;;  %v3066_v57 = vld [vmem:[%s6574_s1 + $0x27c] sm:$0xf0]  ;;  %v2369_v23 = vpop.f32.mrf.mxu0 }
 0x115   :  { %2648 = vmatpush.bf16.msrb.mxu2 %v3825_v60  ;;  %v3642_v60 = vld [vmem:[%s6574_s1 + $0x6fc] sm:$0xf0]  ;;  %v3069_v11 = vor.u32 %v4166_v55, %v3066_v57  ;;  %v2370_v28 = vadd.f32 %v2369_v23, %v2357_v6 }
 0x116   :  { %2614 = vmatpush.bf16.msra.mxu3 %v2781_v14  ;;  %v4378_v14 = vld [vmem:[%s6574_s1 + $0x8f8] sm:$0xf0]  ;;  %v3645_v15 = vor.u32 %v4310_v59, %v3642_v60  ;;  %v2928_v57 = vld [vmem:[%s6574_s1 + $0x140] sm:$0xf] }
 0x117   :  { %2635 = vmatpush.bf16.msrb.mxu1 %v3537_v7  ;;  %v4382_v7 = vld [vmem:[%s6574_s1 + $0x91c] sm:$0xf]  ;;  %v2382_v29 = vpop.f32.mrf.mxu1  ;;  %v3216_v6 = vld [vmem:[%s6574_s1 + $0x380] sm:$0xf] }
 0x118   :  { %2623 = vmatpush.bf16.msrb.mxu0 %v3213_v10  ;;  %v4238_v10 = vld [vmem:[%s6574_s1 + $0x49c] sm:$0xf]  ;;  %v2383_v36 = vadd.f32 %v2382_v29, %v2370_v28  ;;  %v4261_v28 = vld [vmem:[%s6574_s1 + $0x550] sm:$0xf0] }
 0x119   :  { %2649 = vmatpush.bf16.msrb.mxu2 %v3789_v13  ;;  %2615 = vmatmul.bf16.vlgmr.msra.gmra.mxu3 %v4684_v54  ;;  %v3900_v13 = vld [vmem:[%s6574_s1 + $0x8d8] sm:$0xf] }
 0x11a   :  { %2662 = vmatpush.bf16.msrb.mxu3 %v2147_v20  ;;  %v3933_v20 = vor.u32 %v4382_v7, %v3930_v9  ;;  %v3901_v25 = vor.u32 %v4378_v14, %v3900_v13  ;;  %v4207_v7 = vld [vmem:[%s6574_s1 + $0x3a0] sm:$0xf0]  ;;  %v3793_v13 = vor.u32 %v4351_v2, %v3792_v1  ;;  %v3468_v14 = vld [vmem:[%s6574_s1 + $0x578] sm:$0xf]  ;;  %v3072_v1 = vld [vmem:[%s6574_s1 + $0x260] sm:$0xf] }
 0x11b   :  { %2636 = vmatpush.bf16.msrb.mxu1 %v3501_v21  ;;  %v3000_v21 = vld [vmem:[%s6574_s1 + $0x1d0] sm:$0xf]  ;;  %v4171_v2 = vld [vmem:[%s6574_s1 + $0x280] sm:$0xf0] }
 0x11c   :  { %2624 = vmatpush.bf16.msrb.mxu0 %v3177_v24  ;;  %v3357_v24 = vor.u32 %v4238_v10, %v3354_v12  ;;  %v3001_v33 = vor.u32 %v4153_v22, %v3000_v21  ;;  %v2408_v44 = vpop.f32.mrf.mxu3  ;;  %v2371_v59 = vpop.f32.mrf.mxu0  ;;  %v2892_v10 = vld [vmem:[%s6574_s1 + $0xf8] sm:$0xf]  ;;  %v4198_v22 = vld [vmem:[%s6574_s1 + $0x358] sm:$0xf0] }
 0x11d   :  { %2650 = vmatpush.bf16.msrb.mxu2 %v3753_v27  ;;  %v4297_v27 = vld [vmem:[%s6574_s1 + $0x670] sm:$0xf0]  ;;  %v3180_v21 = vld [vmem:[%s6574_s1 + $0x338] sm:$0xf] }
 0x11e   :  { %2663 = vmatpush.bf16.msrb.mxu3 %v4041_v30  ;;  %v3325_v30 = vor.u32 %v4234_v18, %v3324_v17  ;;  %v3217_v17 = vor.u32 %v4207_v7, %v3216_v6  ;;  %v3756_v18 = vld [vmem:[%s6574_s1 + $0x7b8] sm:$0xf]  ;;  %v3181_v29 = vor.u32 %v4198_v22, %v3180_v21 }
 0x11f   :  { %2637 = vmatpush.bf16.msrb.mxu1 %v3465_v34  ;;  %v3288_v34 = vld [vmem:[%s6574_s1 + $0x410] sm:$0xf]  ;;  %v2384_v63 = vpop.f32.mrf.mxu1 }
 0x120   :  { %2625 = vmatpush.bf16.msrb.mxu0 %v3141_v37  ;;  %v3577_v37 = vor.u32 %v4297_v27, %v3576_v26  ;;  %v3289_v45 = vor.u32 %v4225_v35, %v3288_v34  ;;  %v3432_v27 = vld [vmem:[%s6574_s1 + $0x530] sm:$0xf]  ;;  %v4189_v34 = vld [vmem:[%s6574_s1 + $0x310] sm:$0xf0] }
 0x121   :  { %2651 = vmatpush.bf16.msrb.mxu2 %v3717_v39  ;;  %v2395_v39 = vpop.f32.mrf.mxu2  ;;  %v3433_v35 = vor.u32 %v4261_v28, %v3432_v27 }
 0x122   :  { %2664 = vmatpush.bf16.msrb.mxu3 %v4005_v42  ;;  %v4288_v42 = vld [vmem:[%s6574_s1 + $0x628] sm:$0xf0]  ;;  %v2396_v43 = vadd.f32 %v2395_v39, %v2383_v36  ;;  %v2820_v36 = vld [vmem:[%s6574_s1 + $0x68] sm:$0xf] }
 0x123   :  { %2638 = vmatpush.bf16.msrb.mxu1 %v3429_v46  ;;  %v3828_v46 = vld [vmem:[%s6574_s1 + $0x848] sm:$0xf]  ;;  %v3541_v55 = vor.u32 %v4288_v42, %v3540_v41  ;;  %v4252_v39 = vld [vmem:[%s6574_s1 + $0x508] sm:$0xf0] }
 0x124   :  { %2626 = vmatpush.bf16.msrb.mxu0 %v3105_v52  ;;  %v4216_v52 = vld [vmem:[%s6574_s1 + $0x3e8] sm:$0xf0]  ;;  %v2409_v53 = vadd.f32 %v2408_v44, %v2396_v43  ;;  %v3829_v60 = vor.u32 %v4360_v47, %v3828_v46  ;;  %v4080_v43 = vld [vmem:[%s6574_s1 + $0xa40] sm:$0xf]  ;;  %v4423_v44 = vld [vmem:[%s6574_s1 + $0xa60] sm:$0x30] }
 0x125   :  { %2652 = vmatpush.bf16.msrb.mxu2 %v3681_v58  ;;  %v4135_v58 = vld [vmem:[%s6574_s1 + $0x160] sm:$0xf0]  ;;  %v3253_v0 = vor.u32 %v4216_v52, %v3252_v51  ;;  %v4324_v42 = vld [vmem:[%s6574_s1 + $0x748] sm:$0xf0]  ;;  %v3108_v46 = vld [vmem:[%s6574_s1 + $0x2a8] sm:$0xf]  ;;  %v4081_v59 = vor.u32 %v4423_v44, %v4080_v43 }
 0x126   :  { %2665 = vmatpush.bf16.msrb.mxu3 %v3969_v62  ;;  %v4279_v62 = vld [vmem:[%s6574_s1 + $0x5e0] sm:$0xf0]  ;;  %2740 = vst [vmem:[%s6577_s3 + $0x18] sm:$0xff] %v2409_v53  ;;  %v4180_v47 = vld [vmem:[%s6574_s1 + $0x2c8] sm:$0xf0]  ;;  %v396_v53 = vperm.slane %v6285_v49, 4 }
 0x127   :  { %2639 = vmatpush.bf16.msrb.mxu1 %v3393_v5  ;;  %v2929_v5 = vor.u32 %v4135_v58, %v2928_v57  ;;  %v3505_v9 = vor.u32 %v4279_v62, %v3504_v61  ;;  %v2784_v51 = vld [vmem:[%s6574_s1 + $0x20] sm:$0xf]  ;;  %v4099_v52 = vld [vmem:[%s6574_s1 + $0x40] sm:$0xf0]  ;;  %v2150_v7 = vsel %vm2124_vm0, %v4081_v59, 0 }
 0x128   :  { %2627 = vmatpush.bf16.msrb.mxu0 %v3069_v11  ;;  %v4126_v11 = vld [vmem:[%s6574_s1 + $0x118] sm:$0xf0]  ;;  %v3360_v57 = vld [vmem:[%s6574_s1 + $0x4a0] sm:$0xf]  ;;  %v4243_v58 = vld [vmem:[%s6574_s1 + $0x4c0] sm:$0xf0]  ;;  %v2785_v63 = vor.u32 %v4099_v52, %v2784_v51 }
 0x129   :  { %2653 = vmatpush.bf16.msrb.mxu2 %v3645_v15  ;;  %v2397_v12 = vpop.f32.mrf.mxu2  ;;  %v4270_v15 = vld [vmem:[%s6574_s1 + $0x598] sm:$0xf0]  ;;  %v3648_v61 = vld [vmem:[%s6574_s1 + $0x6e0] sm:$0xf]  ;;  %v4315_v62 = vld [vmem:[%s6574_s1 + $0x700] sm:$0xf0] }
 0x12a   :  { %2666 = vmatpush.bf16.msrb.mxu3 %v3933_v20  ;;  %v2893_v20 = vor.u32 %v4126_v11, %v2892_v10  ;;  %v3469_v23 = vor.u32 %v4270_v15, %v3468_v14  ;;  %v4044_v10 = vld [vmem:[%s6574_s1 + $0x9f8] sm:$0xf]  ;;  %v4414_v11 = vld [vmem:[%s6574_s1 + $0xa18] sm:$0xf0]  ;;  %v3073_v12 = vor.u32 %v4171_v2, %v3072_v1 }
 0x12b   :  { %2640 = vmatpush.bf16.msrb.mxu1 %v3357_v24  ;;  %2628 = vmatmul.bf16.vlgmr.msrb.gmra.mxu0 %v4709_v4  ;;  %v2856_v24 = vld [vmem:[%s6574_s1 + $0xb0] sm:$0xf]  ;;  %v4045_v14 = vor.u32 %v4414_v11, %v4044_v10 }
 0x12c   :  { %2672 = vmatpush.bf16.msra.mxu0 %v3037_v16  ;;  %2654 = vmatmul.bf16.vlgmr.msrb.gmra.mxu2 %v4718_v8  ;;  %v2410_v16 = vpop.f32.mrf.mxu3 }
 0x12d   :  { %2698 = vmatpush.bf16.msra.mxu2 %v3613_v19  ;;  %4089 = vmatmul.msk.bf16.vlgmr.msrb.gmra.mxu3 %vm2120_vm1, %v4804_v50  ;;  %v4342_v19 = vld [vmem:[%s6574_s1 + $0x7d8] sm:$0xf0]  ;;  %v4008_v16 = vld [vmem:[%s6574_s1 + $0x9b0] sm:$0xf] }
 0x12e   :  { %2711 = vmatpush.bf16.msra.mxu3 %v3901_v25  ;;  %2641 = vmatmul.bf16.vlgmr.msrb.gmra.mxu1 %v4707_v3  ;;  %v4117_v25 = vld [vmem:[%s6574_s1 + $0xd0] sm:$0xf0]  ;;  %v3757_v26 = vor.u32 %v4342_v19, %v3756_v18 }
 0x12f   :  { %2685 = vmatpush.bf16.msra.mxu1 %v3325_v30  ;;  %v3720_v30 = vld [vmem:[%s6574_s1 + $0x770] sm:$0xf]  ;;  %v2857_v32 = vor.u32 %v4117_v25, %v2856_v24 }
 0x130   :  { %2673 = vmatpush.bf16.msra.mxu0 %v3001_v33  ;;  %v3144_v33 = vld [vmem:[%s6574_s1 + $0x2f0] sm:$0xf]  ;;  %v3721_v38 = vor.u32 %v4333_v31, %v3720_v30 }
 0x131   :  { %2699 = vmatpush.bf16.msra.mxu2 %v3577_v37  ;;  %v4108_v37 = vld [vmem:[%s6574_s1 + $0x88] sm:$0xf0]  ;;  %v3145_v41 = vor.u32 %v4189_v34, %v3144_v33 }
 0x132   :  { %2712 = vmatpush.bf16.msra.mxu3 %v3865_v40  ;;  %v3684_v40 = vld [vmem:[%s6574_s1 + $0x728] sm:$0xf] }
 0x133   :  { %2686 = vmatpush.bf16.msra.mxu1 %v3289_v45  ;;  %v2821_v45 = vor.u32 %v4108_v37, %v2820_v36 }
 0x134   :  { %2674 = vmatpush.bf16.msra.mxu0 %v2965_v48  ;;  %v3397_v48 = vor.u32 %v4252_v39, %v3396_v56 }
 0x135   :  { %2700 = vmatpush.bf16.msra.mxu2 %v3541_v55  ;;  %v3685_v55 = vor.u32 %v4324_v42, %v3684_v40 }
 0x136   :  { %2713 = vmatpush.bf16.msra.mxu3 %v3829_v60  ;;  %v3109_v60 = vor.u32 %v4180_v47, %v3108_v46  ;;  %v398_v46 = vperm.slane %v6285_v49, 6 }
 0x137   :  { %2687 = vmatpush.bf16.msra.mxu1 %v3253_v0  ;;  %v2421_v0 = vpop.f32.mrf.mxu0 }
 0x138   :  { %2675 = vmatpush.bf16.msra.mxu0 %v2929_v5  ;;  %v3361_v5 = vor.u32 %v4243_v58, %v3360_v57  ;;  %v2422_v6 = vadd.f32 %v2421_v0, %v396_v53 }
 0x139   :  { %2701 = vmatpush.bf16.msra.mxu2 %v3505_v9  ;;  %v3649_v9 = vor.u32 %v4315_v62, %v3648_v61 }
 0x13a   :  { %2714 = vmatpush.bf16.msra.mxu3 %v3793_v13  ;;  %v2434_v13 = vpop.f32.mrf.mxu1 }
 0x13b   :  { %2688 = vmatpush.bf16.msra.mxu1 %v3217_v17  ;;  %v2435_v15 = vadd.f32 %v2434_v13, %v2422_v6  ;;  %v4405_v17 = vld [vmem:[%s6574_s1 + $0x9d0] sm:$0xf0]  ;;  %v2447_v18 = vpop.f32.mrf.mxu2 }
 0x13c   :  { %2676 = vmatpush.bf16.msra.mxu0 %v2893_v20  ;;  %v2460_v20 = vpop.f32.mrf.mxu3  ;;  %v4009_v21 = vor.u32 %v4405_v17, %v4008_v16 }
 0x13d   :  { %2702 = vmatpush.bf16.msra.mxu2 %v3469_v23  ;;  %v2448_v22 = vadd.f32 %v2447_v18, %v2435_v15  ;;  %v3972_v23 = vld [vmem:[%s6574_s1 + $0x968] sm:$0xf] }
 0x13e   :  { %2715 = vmatpush.bf16.msra.mxu3 %v3757_v26 }
 0x13f   :  { %2689 = vmatpush.bf16.msra.mxu1 %v3181_v29  ;;  %v2423_v19 = vpop.f32.mrf.mxu0  ;;  %v2461_v25 = vadd.f32 %v2460_v20, %v2448_v22 }
 0x140   :  { %2677 = vmatpush.bf16.msra.mxu0 %v2857_v32  ;;  %v397_v32 = vperm.slane %v6285_v49, 5 }
 0x141   :  { %2703 = vmatpush.bf16.msra.mxu2 %v3433_v35 }
 0x142   :  { %2716 = vmatpush.bf16.msra.mxu3 %v3721_v38  ;;  %v2436_v24 = vpop.f32.mrf.mxu1 }
 0x143   :  { %2690 = vmatpush.bf16.msra.mxu1 %v3145_v41  ;;  %v2449_v26 = vpop.f32.mrf.mxu2 }
 0x144   :  { %2678 = vmatpush.bf16.msra.mxu0 %v2821_v45  ;;  %v2462_v28 = vpop.f32.mrf.mxu3 }
 0x145   :  { %2704 = vmatpush.bf16.msra.mxu2 %v3397_v48 }
 0x146   :  { %2717 = vmatpush.bf16.msra.mxu3 %v3685_v55 }
 0x147   :  { %2691 = vmatpush.bf16.msra.mxu1 %v3109_v60 }
 0x148   :  { %2679 = vmatpush.bf16.msra.mxu0 %v2785_v63  ;;  %v2473_v27 = vpop.f32.mrf.mxu0 }
 0x149   :  { %2705 = vmatpush.bf16.msra.mxu2 %v3361_v5  ;;  %v2474_v30 = vadd.f32 %v2473_v27, %v2461_v25  ;;  %v399_v5 = vperm.slane %v6285_v49, 7  ;;  %v4424_v49 = vld [vmem:[%s6576_s2 + $0x8] ss:$0 sm:$0xff] }
 0x14a   :  { %2718 = vmatpush.bf16.msra.mxu3 %v3649_v9 }
 0x14b   :  { %2680 = vmatmul.bf16.vlgmr.msra.gmra.mxu0 %v4684_v54  ;;  %2692 = vmatpush.bf16.msra.mxu1 %v3073_v12  ;;  %v4396_v54 = vld [vmem:[%s6574_s1 + $0x988] sm:$0xf0]  ;;  %2741 = vst [vmem:[%s6577_s3 + $0x20] sm:$0xff] %v2474_v30 }
 0x14c   :  { %2727 = vmatpush.bf16.msrb.mxu0 %v2150_v7  ;;  %2706 = vmatmul.bf16.vlgmr.msra.gmra.mxu2 %v4707_v3  ;;  %v3973_v3 = vor.u32 %v4396_v54, %v3972_v23 }
 0x14d   :  { %2719 = vmatmul.bf16.vlgmr.msra.gmra.mxu3 %v4718_v8  ;;  %v3936_v8 = vld [vmem:[%s6574_s1 + $0x920] sm:$0xf] }
 0x14e   :  { %2693 = vmatmul.bf16.vlgmr.msra.gmra.mxu1 %v4709_v4  ;;  %v4387_v4 = vld [vmem:[%s6574_s1 + $0x940] sm:$0xf0] }
 0x14f   :  { %v3937_v29 = vor.u32 %v4387_v4, %v3936_v8 }
 0x150   :  { %2728 = vmatpush.bf16.msrb.mxu0 %v4045_v14  ;;  %v2475_v31 = vpop.f32.mrf.mxu0 }
 0x154   :  { %2729 = vmatpush.bf16.msrb.mxu0 %v4009_v21 }
 0x157   :  { %v2486_v33 = vpop.f32.mrf.mxu1 }
 0x158   :  { %2730 = vmatpush.bf16.msrb.mxu0 %v3973_v3  ;;  %v2487_v34 = vadd.f32 %v2486_v33, %v397_v32 }
 0x15b   :  { %v2499_v35 = vpop.f32.mrf.mxu2 }
 0x15c   :  { %2731 = vmatpush.bf16.msrb.mxu0 %v3937_v29  ;;  %v2512_v36 = vpop.f32.mrf.mxu3  ;;  %v2500_v37 = vadd.f32 %v2499_v35, %v2487_v34 }
 0x15e   :  { %v2513_v56 = vadd.f32 %v2512_v36, %v2500_v37 }
 0x15f   :  { %4090 = vmatmul.msk.bf16.vlgmr.msrb.gmra.mxu0 %vm2120_vm1, %v4804_v50  ;;  %v2488_v38 = vpop.f32.mrf.mxu1 }
 0x163   :  { %v2501_v39 = vpop.f32.mrf.mxu2 }
 0x164   :  { %v2514_v40 = vpop.f32.mrf.mxu3 }
 0x168   :  { %v2525_v41 = vpop.f32.mrf.mxu0 }
 0x169   :  { %v2526_v42 = vadd.f32 %v2525_v41, %v2513_v56 }
 0x16b   :  { %v2538_v43 = vpop.f32.mrf.mxu1 }
 0x16c   :  { %v2539_v44 = vadd.f32 %v2538_v43, %v2526_v42 }
 0x16e   :  { %2742 = vst [vmem:[%s6577_s3 + $0x28] sm:$0xff] %v2539_v44 }
 0x170   :  { %v2527_v50 = vpop.f32.mrf.mxu0 }
 0x173   :  { %v2540_v45 = vpop.f32.mrf.mxu1 }
 0x17b   :  { %v2551_v47 = vpop.f32.mrf.mxu2 }
 0x17c   :  { %v2564_v48 = vpop.f32.mrf.mxu3  ;;  %v2552_v51 = vadd.f32 %v2551_v47, %v398_v46 }
 0x17e   :  { %v2565_v52 = vadd.f32 %v2564_v48, %v2552_v51 }
 0x183   :  { %v2553_v53 = vpop.f32.mrf.mxu2 }
 0x184   :  { %v2566_v55 = vpop.f32.mrf.mxu3 }
 0x188   :  { %v2577_v57 = vpop.f32.mrf.mxu0 }
 0x189   :  { %v2578_v58 = vadd.f32 %v2577_v57, %v2565_v52 }
 0x18b   :  { %v2590_v59 = vpop.f32.mrf.mxu1 }
 0x18c   :  { %v2591_v60 = vadd.f32 %v2590_v59, %v2578_v58 }
 0x18f   :  { %v2603_v61 = vpop.f32.mrf.mxu2 }
 0x190   :  { %v2604_v62 = vadd.f32 %v2603_v61, %v2591_v60  ;;  %v2579_v63 = vpop.f32.mrf.mxu0 }
 0x192   :  { %2743 = vst [vmem:[%s6577_s3 + $0x30] sm:$0xff] %v2604_v62 }
 0x193   :  { %v2592_v0 = vpop.f32.mrf.mxu1 }
 0x197   :  { %v2605_v1 = vpop.f32.mrf.mxu2 }
 0x19c   :  { %v2616_v2 = vpop.f32.mrf.mxu3 }
 0x19d   :  { %v2617_v6 = vadd.f32 %v2616_v2, %v399_v5 }
 0x1a4   :  { %v2618_v7 = vpop.f32.mrf.mxu3 }
 0x1a8   :  { %v2629_v9 = vpop.f32.mrf.mxu0 }
 0x1a9   :  { %v2630_v10 = vadd.f32 %v2629_v9, %v2617_v6 }
 0x1ab   :  { %v2642_v11 = vpop.f32.mrf.mxu1 }
 0x1ac   :  { %v2643_v12 = vadd.f32 %v2642_v11, %v2630_v10 }
 0x1af   :  { %v2655_v13 = vpop.f32.mrf.mxu2 }
 0x1b0   :  { %v2631_v14 = vpop.f32.mrf.mxu0  ;;  %v2656_v15 = vadd.f32 %v2655_v13, %v2643_v12  ;;  %v2668_v16 = vpop.f32.mrf.mxu3 }
 0x1b2   :  { %v2669_v17 = vadd.f32 %v2668_v16, %v2656_v15 }
 0x1b3   :  { %v2644_v18 = vpop.f32.mrf.mxu1 }
 0x1b4   :  { %2744 = vst [vmem:[%s6577_s3 + $0x38] sm:$0xff] %v2669_v17 }
 0x1b7   :  { %v2657_v19 = vpop.f32.mrf.mxu2 }
 0x1b8   :  { %v2670_v20 = vpop.f32.mrf.mxu3 }
 0x1c8   :  { %v2681_v21 = vpop.f32.mrf.mxu0 }
 0x1c9   :  { %v2682_v23 = vadd.f32 %v4424_v49, %v2681_v21 }
 0x1cb   :  { %v2694_v22 = vpop.f32.mrf.mxu1 }
 0x1cc   :  { %v2695_v24 = vadd.f32 %v2694_v22, %v2682_v23 }
 0x1cf   :  { %v2707_v54 = vpop.f32.mrf.mxu2 }
 0x1d0   :  { %v2683_v3 = vpop.f32.mrf.mxu0  ;;  %v2720_v25 = vpop.f32.mrf.mxu3  ;;  %v2708_v4 = vadd.f32 %v2707_v54, %v2695_v24 }
 0x1d2   :  { %v2721_v27 = vadd.f32 %v2720_v25, %v2708_v4 }
 0x1d3   :  { %v2696_v8 = vpop.f32.mrf.mxu1 }
 0x1d7   :  { %v2709_v26 = vpop.f32.mrf.mxu2 }
 0x1d8   :  { %v2722_v28 = vpop.f32.mrf.mxu3 }
 0x1dc   :  { %v2733_v29 = vpop.f32.mrf.mxu0 }
 0x1dd   :  { %v2734_v30 = vadd.f32 %v2733_v29, %v2721_v27 }
 0x1df   :  { %2745 = vst [vmem:[%s6577_s3 + $0x40] sm:$0xff] %v2734_v30 }
 0x1e4   :  { %v2735_v31 = vpop.f32.mrf.mxu0 }

</bundles_post_ra>
